<compile_context>
chip_gen: v7x
topology: tpu7x:2x2x1
jax: 0.10.0
libtpu: 0.0.40
codegen_flags: <defaults>
</compile_context>

<pallas_src>
from functools import partial

import numpy as np
import jax
import jax.numpy as jnp
from jax.experimental import pallas as pl
from jax.experimental.pallas import tpu as pltpu

N_NODE = 1024  # self.n_node in the torch module
TN = 512       # streamed tile of w2's output columns per grid step (2 steps)


def _mhps_kernel(n_sets, n_dim, tn, pref_ref, psid_ref, w1_ref, b1_ref,
                 w2_ref, b2_ref, wh_ref, bh_ref, out_ref, h1_ref, acc_ref):
    j = pl.program_id(0)

    @pl.when(j == 0)
    def _init():
        # Shared fc1 trunk (tiny: K = n_obj) computed once, kept resident in
        # VMEM as bf16 so the streamed fc2 matmul runs bf16 on the MXU.
        h1 = jnp.dot(pref_ref[...], w1_ref[...],
                     preferred_element_type=jnp.float32) + b1_ref[...]
        h1_ref[...] = jnp.maximum(h1, 0.0).astype(jnp.bfloat16)
        acc_ref[...] = jnp.zeros_like(acc_ref)

    # fc2 column tile: h2_j = relu(h1 @ w2[:, tile] + b2[tile])  -> [B, TN]
    col0 = pl.multiple_of(j * tn, tn)
    h2 = jnp.dot(h1_ref[...], w2_ref[...], preferred_element_type=jnp.float32)
    h2 = jnp.maximum(h2 + b2_ref[:, pl.ds(col0, tn)], 0.0).astype(jnp.bfloat16)

    # All output heads at once: one [B, TN] @ [TN, n_sets*n_dim] partial,
    # accumulated into a single f32 slab (heads are concatenated on columns).
    acc_ref[...] += jnp.dot(h2, wh_ref[pl.ds(col0, tn), :],
                            preferred_element_type=jnp.float32)

    @pl.when(j == pl.num_programs(0) - 1)
    def _finalize():
        psid = psid_ref[...]                                   # [B, 1] int32
        si = jax.nn.sigmoid(acc_ref[...] + bh_ref[...])        # [B, n_sets*n_dim]
        out = jnp.zeros(out_ref.shape, jnp.float32)
        for i in range(n_sets):
            # Rows whose ps_id matches no head stay zero (matches torch's
            # zero-initialized output when idx.any() is False).
            out = jnp.where(psid == i, si[:, i * n_dim:(i + 1) * n_dim], out)
        out_ref[...] = out


def prepare_params(w1, b1, w2, b2, wh, bh):
    """One-time parameter prep: [in,out] layout, big weights cast to bf16,
    output heads concatenated along the column axis."""
    n_sets, n_node, n_dim = wh.shape
    wh_cat = jnp.transpose(jnp.asarray(wh, jnp.bfloat16), (1, 0, 2))  # [n_node, n_sets, n_dim]
    wh_cat = wh_cat.reshape(n_node, n_sets * n_dim)                   # [n_node, n_sets*n_dim]
    bh_cat = jnp.asarray(bh, jnp.float32).reshape(1, n_sets * n_dim)
    return {
        "w1": jnp.asarray(w1, jnp.float32),                 # [n_obj, n_node]
        "b1": jnp.asarray(b1, jnp.float32).reshape(1, -1),  # [1, n_node]
        "w2": jnp.asarray(w2, jnp.bfloat16),                # [n_node, n_node]
        "b2": jnp.asarray(b2, jnp.float32).reshape(1, -1),  # [1, n_node]
        "wh_cat": wh_cat,                                   # [n_node, n_sets*n_dim] bf16
        "bh_cat": bh_cat,                                   # [1, n_sets*n_dim]
        "n_dim": int(n_dim),
        "n_sets": int(n_sets),
    }


def multi_head_pareto_forward(pref, ps_id, params, *, tn=TN):
    """pref: [B, n_obj] f32, ps_id: [B] int32 in [0, n_sets)."""
    B, n_obj = pref.shape
    n_node = params["w2"].shape[0]
    n_dim, n_sets = params["n_dim"], params["n_sets"]
    hd = n_sets * n_dim
    assert n_node % tn == 0
    steps = n_node // tn

    kernel = partial(_mhps_kernel, n_sets, n_dim, tn)

    flops = 2 * B * (n_obj * n_node + n_node * n_node + n_node * hd)
    bytes_accessed = (
        (params["w2"].size + params["wh_cat"].size) * 2          # bf16 weights
        + (params["w1"].size + 2 * n_node + hd) * 4              # small f32 params
        + (pref.size + B * n_dim) * 4 + B * 4)                   # activations in/out

    grid_spec = pltpu.PrefetchScalarGridSpec(
        num_scalar_prefetch=0,
        grid=(steps,),
        in_specs=[
            pl.BlockSpec((B, n_obj), lambda j: (0, 0)),           # pref (resident)
            pl.BlockSpec((B, 1), lambda j: (0, 0)),               # ps_id (resident)
            pl.BlockSpec((n_obj, n_node), lambda j: (0, 0)),      # w1 (resident)
            pl.BlockSpec((1, n_node), lambda j: (0, 0)),          # b1 (resident)
            pl.BlockSpec((n_node, tn), lambda j: (0, j)),         # w2 tile (bf16, streamed)
            pl.BlockSpec((1, n_node), lambda j: (0, 0)),          # b2 (resident, sliced in-kernel)
            pl.BlockSpec((n_node, hd), lambda j: (0, 0)),         # wh_cat (bf16, resident)
            pl.BlockSpec((1, hd), lambda j: (0, 0)),              # bh_cat (resident)
        ],
        out_specs=pl.BlockSpec((B, n_dim), lambda j: (0, 0)),
        scratch_shapes=[
            pltpu.VMEM((B, n_node), jnp.bfloat16),   # h1 trunk activations
            pltpu.VMEM((B, hd), jnp.float32),        # fused head accumulator
        ],
    )

    # TODO(synk): on v7x the w2 column stream could be split across the two
    # TensorCores (leading 'parallel' axis + per-core partial outputs summed in
    # a tiny epilogue); kept single-core to keep the in-kernel accumulator.
    # TODO(synk): on v5e an int8 w2 path (per-column scales) would halve the
    # dominant weight-stream bytes; bf16 kept here for portability (v7x MXU has
    # no int path).
    out = pl.pallas_call(
        kernel,
        out_shape=jax.ShapeDtypeStruct((B, n_dim), jnp.float32),
        grid_spec=grid_spec,
        compiler_params=pltpu.CompilerParams(
            dimension_semantics=("arbitrary",)),
        cost_estimate=pl.CostEstimate(
            flops=flops,
            transcendentals=B * hd,
            bytes_accessed=bytes_accessed),
    )(
        pref.astype(jnp.float32),
        ps_id.reshape(B, 1).astype(jnp.int32),
        params["w1"], params["b1"],
        params["w2"], params["b2"],
        params["wh_cat"], params["bh_cat"],
    )
    # TODO(synk): torch casts the result to float64; TPU has no native f64, so
    # the kernel output stays float32.
    return out


def _reference(pref, ps_id, params):
    """Plain-JAX reference mirroring the torch forward, with the same bf16
    weight/activation quantization the kernel applies."""
    n_dim, n_sets = params["n_dim"], params["n_sets"]
    h1 = jnp.maximum(pref @ params["w1"] + params["b1"], 0.0)
    h1 = h1.astype(jnp.bfloat16).astype(jnp.float32)
    h2 = jnp.maximum(h1 @ params["w2"].astype(jnp.float32) + params["b2"], 0.0)
    h2 = h2.astype(jnp.bfloat16).astype(jnp.float32)
    full = jax.nn.sigmoid(h2 @ params["wh_cat"].astype(jnp.float32)
                          + params["bh_cat"])
    out = jnp.zeros((pref.shape[0], n_dim), jnp.float32)
    for i in range(n_sets):
        out = jnp.where((ps_id == i)[:, None],
                        full[:, i * n_dim:(i + 1) * n_dim], out)
    return out


if __name__ == "__main__":
    n_obj, n_dim, n_sets, batch = 3, 8, 3, 8

    key = jax.random.PRNGKey(0)
    k = jax.random.split(key, 8)
    w1 = jax.random.normal(k[0], (n_obj, N_NODE), jnp.float32) * 0.1
    b1 = jax.random.normal(k[1], (N_NODE,), jnp.float32) * 0.1
    w2 = jax.random.normal(k[2], (N_NODE, N_NODE), jnp.float32) * 0.02
    b2 = jax.random.normal(k[3], (N_NODE,), jnp.float32) * 0.1
    wh = jax.random.normal(k[4], (n_sets, N_NODE, n_dim), jnp.float32) * 0.02
    bh = jax.random.normal(k[5], (n_sets, n_dim), jnp.float32) * 0.1
    pref = jax.random.uniform(k[6], (batch, n_obj), jnp.float32)
    ps_id = jax.random.randint(k[7], (batch,), 0, n_sets, jnp.int32)

    params = prepare_params(w1, b1, w2, b2, wh, bh)

    out = jax.block_until_ready(multi_head_pareto_forward(pref, ps_id, params))
    ref = jax.block_until_ready(_reference(pref, ps_id, params))

    assert out.shape == (batch, n_dim)
    np.testing.assert_allclose(np.asarray(out), np.asarray(ref),
                               rtol=1e-2, atol=1e-2)
    print("KERNEL_OK")
</pallas_src>

<mosaic_0001>
module attributes {stable_mosaic.version = 11 : i64} {
  func.func @_mhps_kernel(%arg0: i32, %arg1: memref<8x3xf32, #tpu.memory_space<vmem>>, %arg2: memref<8x1xi32, #tpu.memory_space<vmem>>, %arg3: memref<3x1024xf32, #tpu.memory_space<vmem>>, %arg4: memref<1x1024xf32, #tpu.memory_space<vmem>>, %arg5: memref<1024x512xbf16, #tpu.memory_space<vmem>>, %arg6: memref<1x1024xf32, #tpu.memory_space<vmem>>, %arg7: memref<1024x24xbf16, #tpu.memory_space<vmem>>, %arg8: memref<1x24xf32, #tpu.memory_space<vmem>>, %arg9: memref<8x8xf32, #tpu.memory_space<vmem>>, %arg10: memref<8x1024xbf16, #tpu.memory_space<vmem>>, %arg11: memref<8x24xf32, #tpu.memory_space<vmem>>) attributes {dimension_semantics = [#tpu.dimension_semantics<arbitrary>], iteration_bounds = array<i64: 2>, scalar_prefetch = 0 : i64, scratch_operands = 2 : i64, tpu.core_type = #tpu.core_type<tc>, window_params = [{pipeline_mode = #tpu.pipeline_mode<synchronous>, transform_indices = @transform_0, window_bounds = array<i64: 8, 3>}, {pipeline_mode = #tpu.pipeline_mode<synchronous>, transform_indices = @transform_1, window_bounds = array<i64: 8, 1>}, {pipeline_mode = #tpu.pipeline_mode<synchronous>, transform_indices = @transform_2, window_bounds = array<i64: 3, 1024>}, {pipeline_mode = #tpu.pipeline_mode<synchronous>, transform_indices = @transform_3, window_bounds = array<i64: 1, 1024>}, {transform_indices = @transform_4, window_bounds = array<i64: 1024, 512>}, {pipeline_mode = #tpu.pipeline_mode<synchronous>, transform_indices = @transform_5, window_bounds = array<i64: 1, 1024>}, {pipeline_mode = #tpu.pipeline_mode<synchronous>, transform_indices = @transform_6, window_bounds = array<i64: 1024, 24>}, {pipeline_mode = #tpu.pipeline_mode<synchronous>, transform_indices = @transform_7, window_bounds = array<i64: 1, 24>}, {pipeline_mode = #tpu.pipeline_mode<synchronous>, transform_indices = @transform_8, window_bounds = array<i64: 8, 8>}]} {
    %c0_i32 = arith.constant 0 : i32
    %0 = arith.cmpi eq, %arg0, %c0_i32 : i32
    %1 = arith.extui %0 : i1 to i32
    %c0_i32_0 = arith.constant 0 : i32
    %2 = arith.cmpi ne, %1, %c0_i32_0 : i32
    scf.if %2 {
      %c0_13 = arith.constant 0 : index
      %c0_14 = arith.constant 0 : index
      %24 = vector.load %arg1[%c0_13, %c0_14] : memref<8x3xf32, #tpu.memory_space<vmem>>, vector<8x3xf32>
      %c0_15 = arith.constant 0 : index
      %c0_16 = arith.constant 0 : index
      %25 = vector.load %arg3[%c0_15, %c0_16] : memref<3x1024xf32, #tpu.memory_space<vmem>>, vector<3x1024xf32>
      %cst_17 = arith.constant dense<0.000000e+00> : vector<8x1024xf32>
      %26 = tpu.matmul %24, %25, %cst_17 {dimension_numbers = #tpu.dot_dimension_numbers<[1], [0], [0], [1], [0, 0, 1, 1], [], []>} : vector<8x3xf32>, vector<3x1024xf32>, vector<8x1024xf32> -> vector<8x1024xf32>
      %c0_18 = arith.constant 0 : index
      %c0_19 = arith.constant 0 : index
      %27 = vector.load %arg4[%c0_18, %c0_19] : memref<1x1024xf32, #tpu.memory_space<vmem>>, vector<1x1024xf32>
      %28 = vector.broadcast %27 : vector<1x1024xf32> to vector<8x1024xf32>
      %29 = arith.addf %26, %28 : vector<8x1024xf32>
      %cst_20 = arith.constant 0.000000e+00 : f32
      %30 = vector.broadcast %cst_20 : f32 to vector<8x1024xf32>
      %31 = arith.maximumf %29, %30 : vector<8x1024xf32>
      %32 = arith.truncf %31 : vector<8x1024xf32> to vector<8x1024xbf16>
      %c0_21 = arith.constant 0 : index
      %c0_22 = arith.constant 0 : index
      %33 = vector.load %arg10[%c0_21, %c0_22] : memref<8x1024xbf16, #tpu.memory_space<vmem>>, vector<8x1024xbf16>
      tpu.vector_store %arg10[%c0_21, %c0_22], %32 {strides = array<i32>} : memref<8x1024xbf16, #tpu.memory_space<vmem>>, vector<8x1024xbf16>,
      %cst_23 = arith.constant 0.000000e+00 : f32
      %34 = vector.broadcast %cst_23 : f32 to vector<8x24xf32>
      %c0_24 = arith.constant 0 : index
      %c0_25 = arith.constant 0 : index
      %35 = vector.load %arg11[%c0_24, %c0_25] : memref<8x24xf32, #tpu.memory_space<vmem>>, vector<8x24xf32>
      tpu.vector_store %arg11[%c0_24, %c0_25], %34 {strides = array<i32>} : memref<8x24xf32, #tpu.memory_space<vmem>>, vector<8x24xf32>,
    } else {
    }
    %c512_i32 = arith.constant 512 : i32
    %3 = arith.muli %arg0, %c512_i32 : i32
    %4 = tpu.assume_multiple %3, 512 : i32
    %c0 = arith.constant 0 : index
    %c0_1 = arith.constant 0 : index
    %5 = vector.load %arg10[%c0, %c0_1] : memref<8x1024xbf16, #tpu.memory_space<vmem>>, vector<8x1024xbf16>
    %c0_2 = arith.constant 0 : index
    %c0_3 = arith.constant 0 : index
    %6 = vector.load %arg5[%c0_2, %c0_3] : memref<1024x512xbf16, #tpu.memory_space<vmem>>, vector<1024x512xbf16>
    %cst = arith.constant dense<0.000000e+00> : vector<8x512xf32>
    %7 = tpu.matmul %5, %6, %cst {dimension_numbers = #tpu.dot_dimension_numbers<[1], [0], [0], [1], [0, 0, 1, 1], [], []>} : vector<8x1024xbf16>, vector<1024x512xbf16>, vector<8x512xf32> -> vector<8x512xf32>
    %c0_4 = arith.constant 0 : index
    %8 = arith.index_cast %4 : i32 to index
    %9 = vector.load %arg6[%c0_4, %8] : memref<1x1024xf32, #tpu.memory_space<vmem>>, vector<1x512xf32>
    %10 = vector.broadcast %9 : vector<1x512xf32> to vector<8x512xf32>
    %11 = arith.addf %7, %10 : vector<8x512xf32>
    %cst_5 = arith.constant 0.000000e+00 : f32
    %12 = vector.broadcast %cst_5 : f32 to vector<8x512xf32>
    %13 = arith.maximumf %11, %12 : vector<8x512xf32>
    %14 = arith.truncf %13 : vector<8x512xf32> to vector<8x512xbf16>
    %c0_6 = arith.constant 0 : index
    %c0_7 = arith.constant 0 : index
    %15 = vector.load %arg11[%c0_6, %c0_7] : memref<8x24xf32, #tpu.memory_space<vmem>>, vector<8x24xf32>
    %16 = arith.index_cast %4 : i32 to index
    %c0_8 = arith.constant 0 : index
    %17 = vector.load %arg7[%16, %c0_8] : memref<1024x24xbf16, #tpu.memory_space<vmem>>, vector<512x24xbf16>
    %cst_9 = arith.constant dense<0.000000e+00> : vector<8x24xf32>
    %18 = tpu.matmul %14, %17, %cst_9 {dimension_numbers = #tpu.dot_dimension_numbers<[1], [0], [0], [1], [0, 0, 1, 1], [], []>} : vector<8x512xbf16>, vector<512x24xbf16>, vector<8x24xf32> -> vector<8x24xf32>
    %19 = arith.addf %15, %18 : vector<8x24xf32>
    %c0_10 = arith.constant 0 : index
    %c0_11 = arith.constant 0 : index
    %20 = vector.load %arg11[%c0_10, %c0_11] : memref<8x24xf32, #tpu.memory_space<vmem>>, vector<8x24xf32>
    tpu.vector_store %arg11[%c0_10, %c0_11], %19 {strides = array<i32>} : memref<8x24xf32, #tpu.memory_space<vmem>>, vector<8x24xf32>,
    %c1_i32 = arith.constant 1 : i32
    %21 = arith.cmpi eq, %arg0, %c1_i32 : i32
    %22 = arith.extui %21 : i1 to i32
    %c0_i32_12 = arith.constant 0 : i32
    %23 = arith.cmpi ne, %22, %c0_i32_12 : i32
    scf.if %23 {
      %c0_13 = arith.constant 0 : index
      %c0_14 = arith.constant 0 : index
      %24 = vector.load %arg2[%c0_13, %c0_14] : memref<8x1xi32, #tpu.memory_space<vmem>>, vector<8x1xi32>
      %c0_15 = arith.constant 0 : index
      %c0_16 = arith.constant 0 : index
      %25 = vector.load %arg11[%c0_15, %c0_16] : memref<8x24xf32, #tpu.memory_space<vmem>>, vector<8x24xf32>
      %c0_17 = arith.constant 0 : index
      %c0_18 = arith.constant 0 : index
      %26 = vector.load %arg8[%c0_17, %c0_18] : memref<1x24xf32, #tpu.memory_space<vmem>>, vector<1x24xf32>
      %27 = vector.broadcast %26 : vector<1x24xf32> to vector<8x24xf32>
      %28 = arith.addf %25, %27 : vector<8x24xf32>
      %29 = arith.negf %28 : vector<8x24xf32>
      %30 = math.exp %29 : vector<8x24xf32>
      %cst_19 = arith.constant 1.000000e+00 : f32
      %31 = vector.broadcast %cst_19 : f32 to vector<8x24xf32>
      %32 = arith.addf %31, %30 : vector<8x24xf32>
      %33 = arith.divf %31, %32 : vector<8x24xf32>
      %cst_20 = arith.constant 0.000000e+00 : f32
      %34 = vector.broadcast %cst_20 : f32 to vector<8x8xf32>
      %c0_i32_21 = arith.constant 0 : i32
      %35 = vector.broadcast %c0_i32_21 : i32 to vector<8x1xi32>
      %36 = arith.cmpi eq, %24, %35 : vector<8x1xi32>
      %37 = vector.extract_strided_slice %33 {offsets = [0, 0], sizes = [8, 8], strides = [1, 1]} : vector<8x24xf32> to vector<8x8xf32>
      %38 = vector.shape_cast %36 : vector<8x1xi1> to vector<8x1xi1>
      %39 = vector.broadcast %38 : vector<8x1xi1> to vector<8x8xi1>
      %40 = arith.select %39, %37, %34 : vector<8x8xi1>, vector<8x8xf32>
      %c1_i32_22 = arith.constant 1 : i32
      %41 = vector.broadcast %c1_i32_22 : i32 to vector<8x1xi32>
      %42 = arith.cmpi eq, %24, %41 : vector<8x1xi32>
      %43 = vector.extract_strided_slice %33 {offsets = [0, 8], sizes = [8, 8], strides = [1, 1]} : vector<8x24xf32> to vector<8x8xf32>
      %44 = vector.shape_cast %42 : vector<8x1xi1> to vector<8x1xi1>
      %45 = vector.broadcast %44 : vector<8x1xi1> to vector<8x8xi1>
      %46 = arith.select %45, %43, %40 : vector<8x8xi1>, vector<8x8xf32>
      %c2_i32 = arith.constant 2 : i32
      %47 = vector.broadcast %c2_i32 : i32 to vector<8x1xi32>
      %48 = arith.cmpi eq, %24, %47 : vector<8x1xi32>
      %49 = vector.extract_strided_slice %33 {offsets = [0, 16], sizes = [8, 8], strides = [1, 1]} : vector<8x24xf32> to vector<8x8xf32>
      %50 = vector.shape_cast %48 : vector<8x1xi1> to vector<8x1xi1>
      %51 = vector.broadcast %50 : vector<8x1xi1> to vector<8x8xi1>
      %52 = arith.select %51, %49, %46 : vector<8x8xi1>, vector<8x8xf32>
      %c0_23 = arith.constant 0 : index
      %c0_24 = arith.constant 0 : index
      %53 = vector.load %arg9[%c0_23, %c0_24] : memref<8x8xf32, #tpu.memory_space<vmem>>, vector<8x8xf32>
      tpu.vector_store %arg9[%c0_23, %c0_24], %52 {strides = array<i32>} : memref<8x8xf32, #tpu.memory_space<vmem>>, vector<8x8xf32>,
    } else {
    }
    return
  }
  func.func @transform_0(%arg0: i32) -> (i32, i32) {
    %c0_i32 = arith.constant 0 : i32
    %c0_i32_0 = arith.constant 0 : i32
    %c0_i32_1 = arith.constant 0 : i32
    return %c0_i32, %c0_i32_0 : i32, i32
  }
  func.func @transform_1(%arg0: i32) -> (i32, i32) {
    %c0_i32 = arith.constant 0 : i32
    %c0_i32_0 = arith.constant 0 : i32
    %c0_i32_1 = arith.constant 0 : i32
    return %c0_i32, %c0_i32_0 : i32, i32
  }
  func.func @transform_2(%arg0: i32) -> (i32, i32) {
    %c0_i32 = arith.constant 0 : i32
    %c0_i32_0 = arith.constant 0 : i32
    %c0_i32_1 = arith.constant 0 : i32
    return %c0_i32, %c0_i32_0 : i32, i32
  }
  func.func @transform_3(%arg0: i32) -> (i32, i32) {
    %c0_i32 = arith.constant 0 : i32
    %c0_i32_0 = arith.constant 0 : i32
    %c0_i32_1 = arith.constant 0 : i32
    return %c0_i32, %c0_i32_0 : i32, i32
  }
  func.func @transform_4(%arg0: i32) -> (i32, i32) {
    %c0_i32 = arith.constant 0 : i32
    %c0_i32_0 = arith.constant 0 : i32
    return %c0_i32, %arg0 : i32, i32
  }
  func.func @transform_5(%arg0: i32) -> (i32, i32) {
    %c0_i32 = arith.constant 0 : i32
    %c0_i32_0 = arith.constant 0 : i32
    %c0_i32_1 = arith.constant 0 : i32
    return %c0_i32, %c0_i32_0 : i32, i32
  }
  func.func @transform_6(%arg0: i32) -> (i32, i32) {
    %c0_i32 = arith.constant 0 : i32
    %c0_i32_0 = arith.constant 0 : i32
    %c0_i32_1 = arith.constant 0 : i32
    return %c0_i32, %c0_i32_0 : i32, i32
  }
  func.func @transform_7(%arg0: i32) -> (i32, i32) {
    %c0_i32 = arith.constant 0 : i32
    %c0_i32_0 = arith.constant 0 : i32
    %c0_i32_1 = arith.constant 0 : i32
    return %c0_i32, %c0_i32_0 : i32, i32
  }
  func.func @transform_8(%arg0: i32) -> (i32, i32) {
    %c0_i32 = arith.constant 0 : i32
    %c0_i32_0 = arith.constant 0 : i32
    %c0_i32_1 = arith.constant 0 : i32
    return %c0_i32, %c0_i32_0 : i32, i32
  }
}

</mosaic_0001>

<bundles_post_ra>
// kernel: tpu_custom_call.1
= control target key start
LH: loop header
LB: loop body
LE: loop exit
PB: predicated region body
PF: predicated region fallthrough
CT: control target
= control target key end

     0   :  { %13 = vsyncpa [#allocation5], 0  ;;  %s5013_s0 = inlined_call_operand.vmem [shape: f32[8,3], index: 0, kind: input, shape index: {}]   ;;  %s5014_s1 = inlined_call_operand.vmem [shape: s32[8,1], index: 1, kind: input, shape index: {}]   ;;  %s5015_s2 = inlined_call_operand.hbm [shape: f32[3,1024], index: 2, kind: input, shape index: {}]   ;;  %s5016_s3 = inlined_call_operand.hbm [shape: f32[1,1024], index: 3, kind: input, shape index: {}]   ;;  %s5017_s4 = inlined_call_operand.hbm [shape: bf16[1024,1024], index: 4, kind: input, shape index: {}]   ;;  %s5018_s5 = inlined_call_operand.hbm [shape: f32[1,1024], index: 5, kind: input, shape index: {}]   ;;  %s5019_s6 = inlined_call_operand.vmem [shape: bf16[1024,24], index: 6, kind: input, shape index: {}]   ;;  %s5020_s7 = inlined_call_operand.hbm [shape: f32[1,24], index: 7, kind: input, shape index: {}]   ;;  %s5021_s8 = inlined_call_operand.hbm [shape: f32[8,8], index: 8, kind: output, shape index: {}]  }
   0x1   :  { %14 = vsyncpa [#allocation8], 0 }
   0x2   :  { %15 = vsyncpa [#allocation12], 0 }
   0x3   :  { %16 = vsyncpa [#allocation6], 0  ;;  %s4424_s27 = smov 0   ;;  %s4426_s28 = smov 0  }
   0x4   :  { %s4428_s29 = smov 0   ;;  %s4430_s30 = smov 0  }
   0x5 LB: > { %s4443_s9 = sadd.s32 4294967295, %s4364_s30   ;;  %s4446_s10 = sadd.s32 1, %s4364_s30   ;;  %s4364_s30 = sphi %s4430_s30, %s5048_s30   ;;  %s4360_s29 = sphi %s4428_s29, %s5052_s29   ;;  %s4356_s28 = sphi %s4426_s28, %s5051_s28   ;;  %s4352_s27 = sphi %s4424_s27, %s5050_s27  }
   0x6   : > { %5028 = sst [smem:[#allocation20_spill]] %s4446_s10  ;;  %s110_s11 = ssub.s32 %s4364_s30, %s4446_s10 }
   0x7   : > { %s113_s12 = sadd.s32 1, %s4360_s29  ;;  %p111_p0 = scmp.eq.s32.totalorder %s110_s11, 0 }
   0x8   : > { %p120_p1 = scmp.ne.s32.totalorder %s4360_s29, %s4356_s28  ;;  %p121_p2 = scmp.eq.s32.totalorder %s4364_s30, 0 }
   0x9   : > { %p126_p3 = scmp.ne.s32.totalorder %s4356_s28, %s4352_s27  ;;  %p5022_p5 = scmp.eq.s32.totalorder %s4443_s9, 0 }
   0xa   : > { %s4456_s13 = scalar_select %p111_p0, %s4360_s29, %s113_s12  }
   0xb   : > { %p4458_p4 = por %p121_p2, %p120_p1  ;;  %p3200_p6 = scmp.ge.s32.totalorder %s4364_s30, 1 }
   0xc   : > { %5029 = sst [smem:[#allocation21_spill]] %s4456_s13  ;;  %p221_p7 = scmp.lt.s32.totalorder %s4364_s30, 3 }
   0xd   : > { %p4467_p8 = por %p5022_p5, %p126_p3  ;;  %s4366_s17 = smov [#allocation4]  }
   0xe   : > { %p4472_p10 = pnand %p3200_p6, %p221_p7  ;;  %s240_s18 = sshll.u32 %s4366_s17, 4  ;;  %s241_s18 = int_to_ptr.vmem [resolvable:$true] %s240_s18 }
   0xf   : > { %s5031_s15 = scalar_select %p4467_p8, 1, 0 }
  0x10   : > { %s5032_s16 = scalar_select %p4472_p10, 1, 0 }
  0x11   : > { %p3636_p11 = pneg %p4472_p10  ;;  %p3657_p12 = scmp.lt.s32.totalorder %s4364_s30, 2 }
  0x12   : > { %s4367_s20 = smov [#allocation7]   ;;  %s4142_s25 = scalar_lea.hbm %s5015_s2, 512 }
  0x13   : > { %p4481_p13 = pnand %p3636_p11, %p5022_p5  ;;  %s251_s21 = sshll.u32 %s4367_s20, 4  ;;  %s4491_s21 = int_to_ptr.vmem [resolvable:$true] %s251_s21 }
  0x14   : > { %p4487_p0 = pnand %p3657_p12, %p4458_p4  ;;  %p4143_p1 = scmp.ne.s32.totalorder %s5015_s2, %s4142_s25 }
  0x15   : > { %p4501_p2 = pneg %p4481_p13  ;;  %p4149_p6 = scmp.lt.u32.totalorder %s4142_s25, %s5015_s2 }
  0x16   : > { %s5034_s22 = scalar_select %p4487_p0, 1, 0 }
  0x17   : > { %p4145_p3 = pnand %p4501_p2, %p4143_p1 }
  0x19   : > { %p4146_p4 = pneg %p4145_p3 }
  0x1b   : > { %p4151_p7 = pnand %p4149_p6, %p4146_p4 }
  0x1d   : > { %4154 = shalt.err (!%p4151_p7)
}
  0x1e   : > { %s4155_s17 = scalar_lea.vmem %s241_s18, 512  ;;  %p4163_p5 = scmp.lt.s32.totalorder %s241_s18, %s241_s18 }
  0x1f   : > { %p4156_p11 = scmp.ne.s32.totalorder %s241_s18, %s4155_s17  ;;  %p4164_p8 = scmp.lt.s32.totalorder %s4155_s17, %s4155_s17 }
  0x21   : > { %p4158_p12 = pnand %p4156_p11, %p4501_p2  ;;  %p4165_p10 = por %p4164_p8, %p4163_p5 }
  0x23   : > { %p4159_p9 = pneg %p4158_p12 }
  0x25   : > { %p4166_p0 = pnand %p4165_p10, %p4159_p9 }
  0x27   : > { %4169 = shalt.err (!%p4166_p0)
}
  0x28   : > { %3639 = dma.hbm_to_vmem [thread:$0]  (!%p4481_p13), %s5015_s2, 512, %s241_s18, [#allocation5]  }
  0x29   : > { %s4368_s24 = smov [#allocation10]   ;;  %s4170_s12 = scalar_lea.hbm %s5016_s3, 128 }
  0x2a   : > { %s262_s25 = sshll.u32 %s4368_s24, 4  ;;  %p4171_p1 = scmp.ne.s32.totalorder %s5016_s3, %s4170_s12  ;;  %s263_s25 = int_to_ptr.vmem [resolvable:$true] %s262_s25 }
  0x2b   : > { %p4177_p9 = scmp.lt.u32.totalorder %s4170_s12, %s5016_s3 }
  0x2c   : > { %p4173_p5 = pnand %p4171_p1, %p4501_p2 }
  0x2e   : > { %p4174_p8 = pneg %p4173_p5 }
  0x30   : > { %p4179_p10 = pnand %p4177_p9, %p4174_p8 }
  0x32   : > { %4182 = shalt.err (!%p4179_p10)
}
  0x33   : > { %s4183_s18 = scalar_lea.vmem %s4491_s21, 128  ;;  %p4191_p6 = scmp.lt.s32.totalorder %s4491_s21, %s4491_s21 }
  0x34   : > { %p4184_p0 = scmp.ne.s32.totalorder %s4491_s21, %s4183_s18  ;;  %p4192_p7 = scmp.lt.s32.totalorder %s4183_s18, %s4183_s18 }
  0x36   : > { %p4186_p3 = pnand %p4184_p0, %p4501_p2  ;;  %p4193_p11 = por %p4192_p7, %p4191_p6 }
  0x38   : > { %p4187_p4 = pneg %p4186_p3 }
  0x3a   : > { %p4194_p12 = pnand %p4193_p11, %p4187_p4 }
  0x3c   : > { %4197 = shalt.err (!%p4194_p12)
}
  0x3d   : > { %3642 = dma.hbm_to_vmem [thread:$0]  (!%p4481_p13), %s5016_s3, 128, %s4491_s21, [#allocation8]  }
  0x3e   : > { %s4198_s24 = scalar_lea.hbm %s5018_s5, 128 }
  0x3f   : > { %p4199_p1 = scmp.ne.s32.totalorder %s5018_s5, %s4198_s24  ;;  %p4205_p9 = scmp.lt.u32.totalorder %s4198_s24, %s5018_s5 }
  0x41   : > { %p4201_p5 = pnand %p4199_p1, %p4501_p2 }
  0x43   : > { %p4202_p8 = pneg %p4201_p5 }
  0x45   : > { %p4207_p10 = pnand %p4205_p9, %p4202_p8 }
  0x47   : > { %4210 = shalt.err (!%p4207_p10)
}
  0x48   : > { %s4211_s17 = scalar_lea.vmem %s263_s25, 128  ;;  %p4219_p6 = scmp.lt.s32.totalorder %s263_s25, %s263_s25 }
  0x49   : > { %p4212_p0 = scmp.ne.s32.totalorder %s263_s25, %s4211_s17  ;;  %p4220_p7 = scmp.lt.s32.totalorder %s4211_s17, %s4211_s17 }
  0x4b   : > { %p4214_p3 = pnand %p4212_p0, %p4501_p2  ;;  %p4221_p11 = por %p4220_p7, %p4219_p6 }
  0x4d   : > { %p4215_p4 = pneg %p4214_p3 }
  0x4f   : > { %p4222_p12 = pnand %p4221_p11, %p4215_p4 }
  0x51   : > { %4225 = shalt.err (!%p4222_p12)
}
  0x52   : > { %3645 = dma.hbm_to_vmem [thread:$0]  (!%p4481_p13), %s5018_s5, 128, %s263_s25, [#allocation8]  }
  0x53   : > { %s4369_s10 = smov [#allocation11]   ;;  %s287_s20 = sand.u32 1, %s4364_s30  }
  0x54   : > { %s276_s13 = sshll.u32 %s4369_s10, 4  ;;  %s4226_s26 = scalar_lea.hbm %s5020_s7, 16  ;;  %s277_s13 = int_to_ptr.vmem [resolvable:$true] %s276_s13 }
  0x55   : > { %p4227_p1 = scmp.ne.s32.totalorder %s5020_s7, %s4226_s26  ;;  %p4233_p9 = scmp.lt.u32.totalorder %s4226_s26, %s5020_s7 }
  0x57   : > { %p4229_p5 = pnand %p4227_p1, %p4501_p2 }
  0x59   : > { %p4230_p8 = pneg %p4229_p5 }
  0x5b   : > { %p4235_p10 = pnand %p4233_p9, %p4230_p8 }
  0x5d   : > { %4238 = shalt.err (!%p4235_p10)
}
  0x5e   : > { %s4239_s25 = scalar_lea.vmem %s277_s13, 16  ;;  %s4246_s21 = scalar_lea.vmem %s277_s13, 32 }
  0x5f   : > { %p4240_p0 = scmp.ne.s32.totalorder %s277_s13, %s4239_s25  ;;  %p4247_p6 = scmp.lt.s32.totalorder %s277_s13, %s277_s13 }
  0x60   : > { %p4248_p7 = scmp.lt.s32.totalorder %s4246_s21, %s4239_s25 }
  0x61   : > { %p4242_p3 = pnand %p4240_p0, %p4501_p2 }
  0x62   : > { %p4249_p11 = por %p4248_p7, %p4247_p6 }
  0x63   : > { %p4243_p4 = pneg %p4242_p3 }
  0x65   : > { %p4250_p12 = pnand %p4249_p11, %p4243_p4 }
  0x67   : > { %4253 = shalt.err (!%p4250_p12)
}
  0x68   : > { %3648 = dma.hbm_to_vmem [thread:$0]  (!%p4481_p13), %s5020_s7, 16, %s277_s13, [#allocation12]  }
  0x69   : > { %s289_s23 = sand.u32 1, %s4360_s29   ;;  %s3537_s11 = sshll.u32 %s4364_s30, 8 }
  0x6a   : > { %s3206_s24 = sshll.u32 %s289_s23, 11  ;;  %s4582_s12 = scalar_lea.hbm %s5017_s4, %s3537_s11 }
  0x6b   : > { %s291_s19 = scalar_lea.vmem [#allocation9], %s3206_s24  ;;  %s4586_s17 = scalar_lea.sflag [#allocation5], %s287_s20 }
  0x6c   : > { %s298_s14 = sshll.u32 %s291_s19, 4  ;;  %s4254_s25 = scalar_lea.hbm %s4582_s12, 32768  ;;  %s4584_s14 = int_to_ptr.vmem [resolvable:$true] %s298_s14 }
  0x6d   : > { %p4255_p13 = scmp.ne.s32.totalorder %s4582_s12, %s4254_s25  ;;  %p5036_p2 = scmp.ne.s32.totalorder %s5034_s22, 0 }
  0x6e   : > { %s4259_s21 = scalar_lea.hbm %s5017_s4, 65536  ;;  %p4260_p9 = scmp.lt.u32.totalorder %s4582_s12, %s5017_s4 }
  0x6f   : > { %p4256_p1 = pneg %p5036_p2  ;;  %p4261_p10 = scmp.lt.u32.totalorder %s4259_s21, %s4254_s25 }
  0x70   : > { %p4263_p3 = scmp.lt.u32.totalorder %s4254_s25, %s4582_s12 }
  0x71   : > { %p4257_p5 = pnand %p4256_p1, %p4255_p13  ;;  %p4262_p0 = por %p4261_p10, %p4260_p9 }
  0x73   : > { %p4258_p8 = pneg %p4257_p5  ;;  %p4264_p4 = por %p4263_p3, %p4262_p0 }
  0x75   : > { %p4265_p6 = pnand %p4264_p4, %p4258_p8 }
  0x77   : > { %4268 = shalt.err (!%p4265_p6)
}
  0x78   : > { %s4269_s20 = scalar_lea.vmem %s4584_s14, 32768  ;;  %s4370_s23 = smov [#allocation9]  }
  0x79   : > { %p4270_p7 = scmp.ne.s32.totalorder %s4584_s14, %s4269_s20  ;;  %s4274_s11 = sshll.u32 %s4370_s23, 4  ;;  %s4275_s11 = int_to_ptr.vmem [resolvable:$false] %s4274_s11 }
  0x7a   : > { %s4276_s24 = scalar_lea.vmem %s4275_s11, 65536  ;;  %p4277_p13 = scmp.lt.s32.totalorder %s4584_s14, %s4275_s11 }
  0x7b   : > { %p4272_p11 = pnand %p4270_p7, %p4256_p1  ;;  %p4278_p5 = scmp.lt.s32.totalorder %s4276_s24, %s4269_s20 }
  0x7d   : > { %p4273_p12 = pneg %p4272_p11  ;;  %p4279_p9 = por %p4278_p5, %p4277_p13 }
  0x7f   : > { %p4280_p10 = pnand %p4279_p9, %p4273_p12 }
  0x81   : > { %4283 = shalt.err (!%p4280_p10)
}
  0x82   : > { %s4371_s26 = smov 512   ;;  %s4372_s27 = smov 256  }
  0x83   : > { %s4373_s19 = smov 16   ;;  %p5037_p1 = scmp.ne.s32.totalorder %s5032_s16, 0 }
  0x84   : > { %3652 = dma.hbm_to_vmem [thread:$0]  (!%p5036_p2), %s4582_s12, 32768, %s4584_s14, %s4586_s17, %s4371_s26, %s4372_s27, %s4373_s19  }
  0x85   : > { %310 = sbr.rel (%p5037_p1) target bundleno = 1492 (0x5d4), region = 52  ;;  %p5038_p8 = scmp.eq.s32.totalorder (!%p5037_p1), %s4443_s9, 0 }
  0x8c   : > { %4327 = dma.done.wait (%p5038_p8), [#allocation5], 512   ;;  %p5039_p0 = pmov %p5038_p8 }
  0x8e   : > { %4329 = vsyncadd (%p5039_p0), [#allocation5], 4294966784  ;;  %p5040_p3 = pmov %p5039_p0 }
  0x8f   : > { %p5041_p4 = pmov %p5039_p0 }
  0x90   : > { %4331 = dma.done.wait (%p5040_p3), [#allocation8], 128  }
  0x91   : > { %4333 = vsyncadd (%p5041_p4), [#allocation8], 4294967168  ;;  %s320_s22 = sand.u32 1, %s4443_s9   ;;  %s322_s12 = sand.u32 1, %s4356_s28  }
  0x92   : > { %s3212_s14 = sshll.u32 %s322_s12, 11  ;;  %s321_s16 = scalar_lea.sflag [#allocation5], %s320_s22 }
  0x93   : > { %s4626_s17 = scalar_lea.vmem [#allocation9], %s3212_s14  ;;  %p5042_p2 = scmp.ne.s32.totalorder %s5031_s15, 0 }
  0x95   : > { %4335 = dma.done.wait (%p5042_p2), %s321_s16, 32768  }
  0x96   : > { %4337 = vsyncadd (%p5042_p2), %s321_s16, 4294934528  ;;  %p5043_p6 = pmov %p5039_p0 }
  0x97   : > { %p5044_p7 = pmov %p5039_p0 }
  0x98   : > { %4339 = dma.done.wait (%p5043_p6), [#allocation8], 128  }
  0x99   : > { %4341 = vsyncadd (%p5044_p7), [#allocation8], 4294967168  ;;  %p5045_p11 = pmov %p5039_p0 }
  0x9a   : > { %p5046_p12 = pmov %p5039_p0 }
  0x9b   : > { %4343 = dma.done.wait (%p5045_p11), [#allocation12], 16  }
  0x9c   : > { %4345 = vsyncadd (%p5046_p12), [#allocation12], 4294967280  ;;  %p5047_p13 = scmp.ne.s32.totalorder %s4443_s9, 0 }
  0x9d   : > { %v367_v0 = vld [vmem:[#allocation4] sm:$0x77] (!%p5047_p13)  ;;  %vm425_vm0 = vcmask (!%p5047_p13), 1042432   ;;  %v368_v1 = vld [vmem:[#allocation4 + $0x8] sm:$0x77] (!%p5047_p13)  ;;  %v4374_v4 = vmov (!%p5047_p13), 0.0   ;;  %v373_v10 = vlaneseq (!%p5047_p13) }
  0x9e   : > { %365 = sbr.rel (%p5047_p13) target bundleno = 386 (0x182), region = 76  ;;  %v417_v2 = vcombine.high (!%p5047_p13), %v367_v0, %v367_v0  ;;  %v418_v3 = vcombine.high (!%p5047_p13), %v368_v1, %v368_v1  ;;  %506 = vmatprep.mubr.f32.mxu0 (!%p5047_p13), %v4374_v4  ;;  %vm770_vm1 = vcmask (!%p5047_p13), 195584   ;;  %577 = vmatprep.mubr.f32.mxu1 (!%p5047_p13), %v4374_v4  ;;  %v369_v5 = vld [vmem:[#allocation4 + $0x10] sm:$0x77] (!%p5047_p13)  ;;  %vm421_vm2 = vcmask (!%p5047_p13), 23552   ;;  %v371_v14 = vld [vmem:[#allocation7] sm:$0xff] (!%p5047_p13) }
  0x9f   : > { %771 = vst.msk [vmem:[#allocation3] sm:$0xff] (!%p5047_p13), %vm770_vm1, %v4374_v4  ;;  %v366_v6 = vld [vmem:[%s5013_s0] sm:$0xff] (!%p5047_p13)  ;;  %v419_v7 = vcombine.high (!%p5047_p13), %v369_v5, %v369_v5  ;;  %v370_v8 = vld [vmem:[#allocation4 + $0x18] sm:$0x77] (!%p5047_p13)  ;;  %v374_v11 = vshrl.u32 (!%p5047_p13), %v373_v10, 7 }
  0xa0   : > { %3216 = vmatprep.subr.msk.mxu0 (!%p5047_p13), %vm425_vm0, %v417_v2  ;;  %3219 = vmatprep.subr.msk.mxu1 (!%p5047_p13), %vm425_vm0, %v418_v3  ;;  %v420_v9 = vcombine.high (!%p5047_p13), %v370_v8, %v370_v8 }
  0xa1   : > { %3217 = vmatpush1.msk.msra.mxu0 (!%p5047_p13), %vm425_vm0, %v367_v0  ;;  %3220 = vmatpush1.msk.msra.mxu1 (!%p5047_p13), %vm425_vm0, %v368_v1  ;;  %v375_v12 = vsub.s32 (!%p5047_p13), 0, %v374_v11  ;;  %v383_v13 = vsub.s32 (!%p5047_p13), 2, %v374_v11  ;;  %v379_v15 = vsub.s32 (!%p5047_p13), 1, %v374_v11  ;;  %v387_v16 = vsub.s32 (!%p5047_p13), 3, %v374_v11 }
  0xa2   : > { %3218 = vmatmul.mubr.msk.f32.vlgmr.msra.gmra.mrb[0].mxu0 (!%p5047_p13), %vm421_vm2, %v366_v6  ;;  %3221 = vmatmul.mubr.msk.f32.vlgmr.msra.gmra.mrb[0].mxu1 (!%p5047_p13), %vm421_vm2, %v366_v6  ;;  %v391_v19 = vsub.s32 (!%p5047_p13), 4, %v374_v11  ;;  %v399_v20 = vsub.s32 (!%p5047_p13), 6, %v374_v11  ;;  %v395_v23 = vsub.s32 (!%p5047_p13), 5, %v374_v11  ;;  %v403_v24 = vsub.s32 (!%p5047_p13), 7, %v374_v11 }
  0xa3   : > { %3222 = vmatprep.subr.msk.mxu0 (!%p5047_p13), %vm425_vm0, %v419_v7  ;;  %3225 = vmatprep.subr.msk.mxu1 (!%p5047_p13), %vm425_vm0, %v420_v9  ;;  %v376_v17 = vrot.slane (!%p5047_p13), %v371_v14, %v375_v12  ;;  %v384_v18 = vrot.slane (!%p5047_p13), %v371_v14, %v383_v13  ;;  %v380_v21 = vrot.slane (!%p5047_p13), %v371_v14, %v379_v15 }
  0xa4   : > { %3223 = vmatpush1.msk.msra.mxu0 (!%p5047_p13), %vm425_vm0, %v369_v5  ;;  %3226 = vmatpush1.msk.msra.mxu1 (!%p5047_p13), %vm425_vm0, %v370_v8  ;;  %v388_v22 = vrot.slane (!%p5047_p13), %v371_v14, %v387_v16  ;;  %v392_v31 = vrot.slane (!%p5047_p13), %v371_v14, %v391_v19  ;;  %v400_v32 = vrot.slane (!%p5047_p13), %v371_v14, %v399_v20 }
  0xa5   : > { %648 = vmatprep.mubr.f32.mxu0 %v4374_v4  ;;  %719 = vmatprep.mubr.f32.mxu1 %v4374_v4  ;;  %v396_v35 = vrot.slane %v371_v14, %v395_v23  ;;  %v404_v36 = vrot.slane %v371_v14, %v403_v24 }
  0xa6   : > { %3224 = vmatmul.mubr.msk.f32.vlgmr.msra.gmra.mrb[2].mxu0 %vm421_vm2, %v366_v6  ;;  %3227 = vmatmul.mubr.msk.f32.vlgmr.msra.gmra.mrb[2].mxu1 %vm421_vm2, %v366_v6 }
 0x175   : > { %v508_v25 = vpop.f32.mrb[0].mxu0  ;;  %v579_v26 = vpop.f32.mrb[0].mxu1 }
 0x176   : > { %v509_v27 = vadd.f32 %v508_v25, %v376_v17  ;;  %v580_v28 = vadd.f32 %v579_v26, %v384_v18  ;;  %v510_v29 = vpop.f32.mrb[1].mxu0  ;;  %v581_v30 = vpop.f32.mrb[1].mxu1 }
 0x177   : > { %v511_v33 = vadd.f32 %v510_v29, %v380_v21  ;;  %v582_v34 = vadd.f32 %v581_v30, %v388_v22 }
 0x178   : > { %v726_v37 = vmax.f32 %v509_v27, 0.0  ;;  %v728_v38 = vmax.f32 %v580_v28, 0.0 }
 0x179   : > { %v727_v39 = vmax.f32 %v511_v33, 0.0  ;;  %v729_v40 = vmax.f32 %v582_v34, 0.0  ;;  %v650_v41 = vpop.f32.mrb[2].mxu0  ;;  %v721_v42 = vpop.f32.mrb[2].mxu1 }
 0x17a   : > { %v651_v43 = vadd.f32 %v650_v41, %v392_v31  ;;  %v722_v44 = vadd.f32 %v721_v42, %v400_v32  ;;  %v652_v45 = vpop.f32.mrb[3].mxu0  ;;  %v723_v46 = vpop.f32.mrb[3].mxu1 }
 0x17b   : > { %v3538_v47 = vpack.c.bf16 %v727_v39, %v726_v37  ;;  %v3539_v48 = vpack.c.bf16 %v729_v40, %v728_v38  ;;  %v653_v49 = vadd.f32 %v652_v45, %v396_v35  ;;  %v724_v50 = vadd.f32 %v723_v46, %v404_v36 }
 0x17c   : > { %v730_v51 = vmax.f32 %v651_v43, 0.0  ;;  %v732_v52 = vmax.f32 %v722_v44, 0.0 }
 0x17d   : > { %766 = vst [vmem:[#allocation2] sm:$0xff] %v3538_v47  ;;  %767 = vst [vmem:[#allocation2 + $0x8] sm:$0xff] %v3539_v48  ;;  %v731_v53 = vmax.f32 %v653_v49, 0.0  ;;  %v733_v54 = vmax.f32 %v724_v50, 0.0 }
 0x17f   : > { %v3540_v55 = vpack.c.bf16 %v731_v53, %v730_v51  ;;  %v3541_v56 = vpack.c.bf16 %v733_v54, %v732_v52 }
 0x181   : > { %768 = vst [vmem:[#allocation2 + $0x10] sm:$0xff] %v3540_v55  ;;  %769 = vst [vmem:[#allocation2 + $0x18] sm:$0xff] %v3541_v56 }
 0x182 PF: > { %v3712_v57 = vld [vmem:[%s4626_s17 + $0x4] ss:$16 sps:$4 sm:$0xff]   ;;  %v3714_v58 = vld [vmem:[%s4626_s17 + $0xc] ss:$16 sps:$4 sm:$0xff]   ;;  %v3716_v59 = vld [vmem:[%s4626_s17] ss:$16 sps:$4 sm:$0xff]  }
 0x183   : > { %2366 = vmatprep.subr.bf16.mxu0 %v3712_v57  ;;  %v3717_v60 = vld [vmem:[%s4626_s17 + $0x8] ss:$16 sps:$4 sm:$0xff]   ;;  %2530 = vmatprep.subr.bf16.mxu1 %v3714_v58  ;;  %v3718_v61 = vld [vmem:[%s4626_s17 + $0x24] ss:$16 sps:$4 sm:$0xff]   ;;  %v3720_v62 = vld [vmem:[%s4626_s17 + $0x2c] ss:$16 sps:$4 sm:$0xff]  }
 0x184   : > { %2367 = vmatpush1.bf16.msra.mxu0 %v3716_v59  ;;  %2531 = vmatpush1.bf16.msra.mxu1 %v3717_v60  ;;  %v3722_v63 = vld [vmem:[%s4626_s17 + $0x20] ss:$16 sps:$4 sm:$0xff]   ;;  %v3723_v0 = vld [vmem:[%s4626_s17 + $0x28] ss:$16 sps:$4 sm:$0xff]   ;;  %v3724_v1 = vld [vmem:[%s4626_s17 + $0x44] ss:$16 sps:$4 sm:$0xff]  }
 0x185   : > { %2368 = vmatprep.subr.bf16.mxu0 %v3718_v61  ;;  %2532 = vmatprep.subr.bf16.mxu1 %v3720_v62  ;;  %v3726_v2 = vld [vmem:[%s4626_s17 + $0x4c] ss:$16 sps:$4 sm:$0xff]   ;;  %v3728_v3 = vld [vmem:[%s4626_s17 + $0x40] ss:$16 sps:$4 sm:$0xff]   ;;  %v3729_v4 = vld [vmem:[%s4626_s17 + $0x48] ss:$16 sps:$4 sm:$0xff]  }
 0x186   : > { %v3730_v5 = vld [vmem:[%s4626_s17 + $0x64] ss:$16 sps:$4 sm:$0xff]   ;;  %v3732_v6 = vld [vmem:[%s4626_s17 + $0x6c] ss:$16 sps:$4 sm:$0xff]   ;;  %v3734_v7 = vld [vmem:[%s4626_s17 + $0x60] ss:$16 sps:$4 sm:$0xff]  }
 0x187   : > { %v3735_v8 = vld [vmem:[%s4626_s17 + $0x68] ss:$16 sps:$4 sm:$0xff]   ;;  %v3736_v9 = vld [vmem:[%s4626_s17 + $0x84] ss:$16 sps:$4 sm:$0xff]   ;;  %v3738_v10 = vld [vmem:[%s4626_s17 + $0x8c] ss:$16 sps:$4 sm:$0xff]  }
 0x188   : > { %2369 = vmatpush1.bf16.msra.mxu0 %v3722_v63  ;;  %2533 = vmatpush1.bf16.msra.mxu1 %v3723_v0  ;;  %v3740_v11 = vld [vmem:[%s4626_s17 + $0x80] ss:$16 sps:$4 sm:$0xff]   ;;  %v3741_v12 = vld [vmem:[%s4626_s17 + $0x88] ss:$16 sps:$4 sm:$0xff]   ;;  %v3742_v13 = vld [vmem:[%s4626_s17 + $0xa4] ss:$16 sps:$4 sm:$0xff]  }
 0x189   : > { %2370 = vmatprep.subr.bf16.mxu0 %v3724_v1  ;;  %2534 = vmatprep.subr.bf16.mxu1 %v3726_v2  ;;  %v3744_v14 = vld [vmem:[%s4626_s17 + $0xac] ss:$16 sps:$4 sm:$0xff]   ;;  %v3746_v15 = vld [vmem:[%s4626_s17 + $0xa0] ss:$16 sps:$4 sm:$0xff]   ;;  %v3747_v16 = vld [vmem:[%s4626_s17 + $0xa8] ss:$16 sps:$4 sm:$0xff]  }
 0x18a   : > { %v3748_v17 = vld [vmem:[%s4626_s17 + $0xc4] ss:$16 sps:$4 sm:$0xff]   ;;  %v3750_v18 = vld [vmem:[%s4626_s17 + $0xcc] ss:$16 sps:$4 sm:$0xff]   ;;  %v3752_v19 = vld [vmem:[%s4626_s17 + $0xc0] ss:$16 sps:$4 sm:$0xff]  }
 0x18b   : > { %v3753_v20 = vld [vmem:[%s4626_s17 + $0xc8] ss:$16 sps:$4 sm:$0xff]   ;;  %v3754_v21 = vld [vmem:[%s4626_s17 + $0xe4] ss:$16 sps:$4 sm:$0xff]   ;;  %v3756_v22 = vld [vmem:[%s4626_s17 + $0xec] ss:$16 sps:$4 sm:$0xff]  }
 0x18c   : > { %2371 = vmatpush1.bf16.msra.mxu0 %v3728_v3  ;;  %2535 = vmatpush1.bf16.msra.mxu1 %v3729_v4  ;;  %v3758_v23 = vld [vmem:[%s4626_s17 + $0xe0] ss:$16 sps:$4 sm:$0xff]   ;;  %v3759_v24 = vld [vmem:[%s4626_s17 + $0xe8] ss:$16 sps:$4 sm:$0xff]   ;;  %v3760_v25 = vld [vmem:[%s4626_s17 + $0x104] ss:$16 sps:$4 sm:$0xff]  }
 0x18d   : > { %2372 = vmatprep.subr.bf16.mxu0 %v3730_v5  ;;  %2536 = vmatprep.subr.bf16.mxu1 %v3732_v6  ;;  %v3762_v26 = vld [vmem:[%s4626_s17 + $0x10c] ss:$16 sps:$4 sm:$0xff]   ;;  %v3764_v27 = vld [vmem:[%s4626_s17 + $0x100] ss:$16 sps:$4 sm:$0xff]   ;;  %v3765_v28 = vld [vmem:[%s4626_s17 + $0x108] ss:$16 sps:$4 sm:$0xff]  }
 0x18e   : > { %v3766_v29 = vld [vmem:[%s4626_s17 + $0x124] ss:$16 sps:$4 sm:$0xff]   ;;  %v3768_v30 = vld [vmem:[%s4626_s17 + $0x12c] ss:$16 sps:$4 sm:$0xff]   ;;  %v3770_v31 = vld [vmem:[%s4626_s17 + $0x120] ss:$16 sps:$4 sm:$0xff]  }
 0x18f   : > { %v3771_v32 = vld [vmem:[%s4626_s17 + $0x128] ss:$16 sps:$4 sm:$0xff]   ;;  %v3772_v33 = vld [vmem:[%s4626_s17 + $0x144] ss:$16 sps:$4 sm:$0xff]   ;;  %v3774_v34 = vld [vmem:[%s4626_s17 + $0x14c] ss:$16 sps:$4 sm:$0xff]  }
 0x190   : > { %2373 = vmatpush1.bf16.msra.mxu0 %v3734_v7  ;;  %2537 = vmatpush1.bf16.msra.mxu1 %v3735_v8  ;;  %v3776_v35 = vld [vmem:[%s4626_s17 + $0x140] ss:$16 sps:$4 sm:$0xff]   ;;  %v3777_v36 = vld [vmem:[%s4626_s17 + $0x148] ss:$16 sps:$4 sm:$0xff]   ;;  %v3778_v37 = vld [vmem:[%s4626_s17 + $0x164] ss:$16 sps:$4 sm:$0xff]  }
 0x191   : > { %2374 = vmatprep.subr.bf16.mxu0 %v3736_v9  ;;  %2538 = vmatprep.subr.bf16.mxu1 %v3738_v10  ;;  %v3780_v38 = vld [vmem:[%s4626_s17 + $0x16c] ss:$16 sps:$4 sm:$0xff]   ;;  %v773_v39 = vld [vmem:[#allocation2] sm:$0xff]  ;;  %v3783_v42 = vld [vmem:[%s4626_s17 + $0x168] ss:$16 sps:$4 sm:$0xff]   ;;  %s3232_s30 = sshll.u32 %s4443_s9, 9 }
 0x192   : > { %v3782_v40 = vld [vmem:[%s4626_s17 + $0x160] ss:$16 sps:$4 sm:$0xff]   ;;  %v3234_v41 = vcombine.high %v773_v39, %v773_v39  ;;  %v3784_v43 = vld [vmem:[%s4626_s17 + $0x184] ss:$16 sps:$4 sm:$0xff]   ;;  %v3786_v44 = vld [vmem:[%s4626_s17 + $0x18c] ss:$16 sps:$4 sm:$0xff]   ;;  %v3233_v61 = vcombine.low %v773_v39, %v773_v39 }
 0x193   : > { %v3788_v45 = vld [vmem:[%s4626_s17 + $0x180] ss:$16 sps:$4 sm:$0xff]   ;;  %v3789_v46 = vld [vmem:[%s4626_s17 + $0x188] ss:$16 sps:$4 sm:$0xff]   ;;  %v3790_v47 = vld [vmem:[%s4626_s17 + $0x1a4] ss:$16 sps:$4 sm:$0xff]  }
 0x194   : > { %2375 = vmatpush1.bf16.msra.mxu0 %v3740_v11  ;;  %2539 = vmatpush1.bf16.msra.mxu1 %v3741_v12  ;;  %v3792_v48 = vld [vmem:[%s4626_s17 + $0x1ac] ss:$16 sps:$4 sm:$0xff]   ;;  %v3794_v49 = vld [vmem:[%s4626_s17 + $0x1a0] ss:$16 sps:$4 sm:$0xff]   ;;  %v3795_v50 = vld [vmem:[%s4626_s17 + $0x1a8] ss:$16 sps:$4 sm:$0xff]  }
 0x195   : > { %2376 = vmatprep.subr.bf16.mxu0 %v3742_v13  ;;  %2540 = vmatprep.subr.bf16.mxu1 %v3744_v14  ;;  %v3796_v51 = vld [vmem:[%s4626_s17 + $0x1c4] ss:$16 sps:$4 sm:$0xff]   ;;  %v3798_v52 = vld [vmem:[%s4626_s17 + $0x1cc] ss:$16 sps:$4 sm:$0xff]   ;;  %v3800_v53 = vld [vmem:[%s4626_s17 + $0x1c0] ss:$16 sps:$4 sm:$0xff]  }
 0x196   : > { %2398 = vmatprep.mubr.bf16.mxu0 %v3234_v41  ;;  %2562 = vmatprep.mubr.bf16.mxu1 %v3234_v41  ;;  %v3801_v54 = vld [vmem:[%s4626_s17 + $0x1c8] ss:$16 sps:$4 sm:$0xff]   ;;  %v3802_v55 = vld [vmem:[%s4626_s17 + $0x1e4] ss:$16 sps:$4 sm:$0xff]   ;;  %v3804_v56 = vld [vmem:[%s4626_s17 + $0x1ec] ss:$16 sps:$4 sm:$0xff]  }
 0x197   : > { %v3806_v57 = vld [vmem:[%s4626_s17 + $0x1e0] ss:$16 sps:$4 sm:$0xff]   ;;  %v3807_v58 = vld [vmem:[%s4626_s17 + $0x1e8] ss:$16 sps:$4 sm:$0xff]   ;;  %v3812_v59 = vld [vmem:[%s4626_s17 + $0x204] ss:$16 sps:$4 sm:$0xff]  }
 0x198   : > { %2377 = vmatpush1.bf16.msra.mxu0 %v3746_v15  ;;  %2541 = vmatpush1.bf16.msra.mxu1 %v3747_v16  ;;  %v3815_v60 = vld [vmem:[%s4626_s17 + $0x20c] ss:$16 sps:$4 sm:$0xff]   ;;  %v3810_v62 = vld [vmem:[%s4626_s17 + $0x200] ss:$16 sps:$4 sm:$0xff]   ;;  %v3813_v63 = vld [vmem:[%s4626_s17 + $0x208] ss:$16 sps:$4 sm:$0xff]  }
 0x199   : > { %2378 = vmatprep.subr.bf16.mxu0 %v3748_v17  ;;  %2542 = vmatprep.subr.bf16.mxu1 %v3750_v18  ;;  %v3818_v0 = vld [vmem:[%s4626_s17 + $0x224] ss:$16 sps:$4 sm:$0xff]   ;;  %v3821_v1 = vld [vmem:[%s4626_s17 + $0x22c] ss:$16 sps:$4 sm:$0xff]   ;;  %v3816_v2 = vld [vmem:[%s4626_s17 + $0x220] ss:$16 sps:$4 sm:$0xff]  }
 0x19a   : > { %v3819_v3 = vld [vmem:[%s4626_s17 + $0x228] ss:$16 sps:$4 sm:$0xff]   ;;  %v3824_v4 = vld [vmem:[%s4626_s17 + $0x244] ss:$16 sps:$4 sm:$0xff]   ;;  %v3827_v5 = vld [vmem:[%s4626_s17 + $0x24c] ss:$16 sps:$4 sm:$0xff]  }
 0x19b   : > { %v3822_v6 = vld [vmem:[%s4626_s17 + $0x240] ss:$16 sps:$4 sm:$0xff]   ;;  %v3825_v7 = vld [vmem:[%s4626_s17 + $0x248] ss:$16 sps:$4 sm:$0xff]   ;;  %v3830_v8 = vld [vmem:[%s4626_s17 + $0x264] ss:$16 sps:$4 sm:$0xff]  }
 0x19c   : > { %2379 = vmatpush1.bf16.msra.mxu0 %v3752_v19  ;;  %2543 = vmatpush1.bf16.msra.mxu1 %v3753_v20  ;;  %v3833_v9 = vld [vmem:[%s4626_s17 + $0x26c] ss:$16 sps:$4 sm:$0xff]   ;;  %v3828_v10 = vld [vmem:[%s4626_s17 + $0x260] ss:$16 sps:$4 sm:$0xff]   ;;  %v3831_v11 = vld [vmem:[%s4626_s17 + $0x268] ss:$16 sps:$4 sm:$0xff]  }
 0x19d   : > { %2380 = vmatprep.subr.bf16.mxu0 %v3754_v21  ;;  %2544 = vmatprep.subr.bf16.mxu1 %v3756_v22  ;;  %v3836_v12 = vld [vmem:[%s4626_s17 + $0x284] ss:$16 sps:$4 sm:$0xff]   ;;  %v3839_v13 = vld [vmem:[%s4626_s17 + $0x28c] ss:$16 sps:$4 sm:$0xff]   ;;  %v3834_v14 = vld [vmem:[%s4626_s17 + $0x280] ss:$16 sps:$4 sm:$0xff]  }
 0x19e   : > { %v3837_v15 = vld [vmem:[%s4626_s17 + $0x288] ss:$16 sps:$4 sm:$0xff]   ;;  %v3842_v16 = vld [vmem:[%s4626_s17 + $0x2a4] ss:$16 sps:$4 sm:$0xff]   ;;  %v3845_v17 = vld [vmem:[%s4626_s17 + $0x2ac] ss:$16 sps:$4 sm:$0xff]  }
 0x19f   : > { %v3840_v18 = vld [vmem:[%s4626_s17 + $0x2a0] ss:$16 sps:$4 sm:$0xff]   ;;  %v3843_v19 = vld [vmem:[%s4626_s17 + $0x2a8] ss:$16 sps:$4 sm:$0xff]   ;;  %v3848_v20 = vld [vmem:[%s4626_s17 + $0x2c4] ss:$16 sps:$4 sm:$0xff]  }
 0x1a0   : > { %2381 = vmatpush1.bf16.msra.mxu0 %v3758_v23  ;;  %2545 = vmatpush1.bf16.msra.mxu1 %v3759_v24  ;;  %v3851_v21 = vld [vmem:[%s4626_s17 + $0x2cc] ss:$16 sps:$4 sm:$0xff]   ;;  %v3846_v24 = vld [vmem:[%s4626_s17 + $0x2c0] ss:$16 sps:$4 sm:$0xff]   ;;  %v3873_v41 = vld [vmem:[%s4626_s17 + $0x348] ss:$16 sps:$4 sm:$0xff]  }
 0x1a1   : > { %2382 = vmatprep.subr.bf16.mxu0 %v3760_v25  ;;  %2546 = vmatprep.subr.bf16.mxu1 %v3762_v26  ;;  %v4747_v22 = vld [vmem:[#allocation2 + $0x8] sm:$0xff]  ;;  %v3854_v26 = vld [vmem:[%s4626_s17 + $0x2e4] ss:$16 sps:$4 sm:$0xff]   ;;  %s2703_s13 = sshra.s32 %s3232_s30, 3  ;;  %s1033_s23 = sshra.s32 %s3232_s30, 7  ;;  %vm3044_vm3 = vcmask 195584  }
 0x1a2   : > { %v3236_v23 = vcombine.high %v4747_v22, %v4747_v22  ;;  %v3849_v25 = vld [vmem:[%s4626_s17 + $0x2c8] ss:$16 sps:$4 sm:$0xff]   ;;  %v3875_v39 = vld [vmem:[%s4626_s17 + $0x34c] ss:$16 sps:$4 sm:$0xff]   ;;  %s3497_s21 = sshll.u32 %s2703_s13, 2  ;;  %s1035_s11 = scalar_lea.vmem [#allocation10], %s1033_s23 }
 0x1a3   : > { %s4849_s20 = scalar_lea.vmem %s5019_s6, %s3497_s21  ;;  %p3530_p5 = scmp.ne.s32.totalorder %s4443_s9, 1 }
 0x1a4   : > { %2383 = vmatpush1.bf16.msra.mxu0 %v3764_v27  ;;  %2547 = vmatpush1.bf16.msra.mxu1 %v3765_v28  ;;  %v3857_v27 = vld [vmem:[%s4626_s17 + $0x2ec] ss:$16 sps:$4 sm:$0xff]   ;;  %v3852_v28 = vld [vmem:[%s4626_s17 + $0x2e0] ss:$16 sps:$4 sm:$0xff]   ;;  %s4376_s27 = smov (!%p3530_p5), 8   ;;  %s4377_s19 = smov (!%p3530_p5), 112  }
 0x1a5   : > { %2384 = vmatprep.subr.bf16.mxu0 %v3766_v29  ;;  %2548 = vmatprep.subr.bf16.mxu1 %v3768_v30  ;;  %v3855_v29 = vld [vmem:[%s4626_s17 + $0x2e8] ss:$16 sps:$4 sm:$0xff]   ;;  %v3860_v30 = vld [vmem:[%s4626_s17 + $0x304] ss:$16 sps:$4 sm:$0xff]   ;;  %vm3099_vm10 = vcmask (!%p3530_p5), 64512  }
 0x1a8   : > { %2385 = vmatpush1.bf16.msra.mxu0 %v3770_v31  ;;  %2549 = vmatpush1.bf16.msra.mxu1 %v3771_v32  ;;  %v3863_v31 = vld [vmem:[%s4626_s17 + $0x30c] ss:$16 sps:$4 sm:$0xff]   ;;  %v3858_v32 = vld [vmem:[%s4626_s17 + $0x300] ss:$16 sps:$4 sm:$0xff]  }
 0x1a9   : > { %2386 = vmatprep.subr.bf16.mxu0 %v3772_v33  ;;  %2550 = vmatprep.subr.bf16.mxu1 %v3774_v34  ;;  %v3861_v33 = vld [vmem:[%s4626_s17 + $0x308] ss:$16 sps:$4 sm:$0xff]   ;;  %v3866_v34 = vld [vmem:[%s4626_s17 + $0x324] ss:$16 sps:$4 sm:$0xff]  }
 0x1ac   : > { %2387 = vmatpush1.bf16.msra.mxu0 %v3776_v35  ;;  %2551 = vmatpush1.bf16.msra.mxu1 %v3777_v36  ;;  %v3869_v35 = vld [vmem:[%s4626_s17 + $0x32c] ss:$16 sps:$4 sm:$0xff]   ;;  %v3864_v36 = vld [vmem:[%s4626_s17 + $0x320] ss:$16 sps:$4 sm:$0xff]  }
 0x1ad   : > { %2388 = vmatprep.subr.bf16.mxu0 %v3778_v37  ;;  %2552 = vmatprep.subr.bf16.mxu1 %v3780_v38  ;;  %v3867_v37 = vld [vmem:[%s4626_s17 + $0x328] ss:$16 sps:$4 sm:$0xff]   ;;  %v3872_v38 = vld [vmem:[%s4626_s17 + $0x344] ss:$16 sps:$4 sm:$0xff]  }
 0x1b0   : > { %2389 = vmatpush1.bf16.msra.mxu0 %v3782_v40  ;;  %2553 = vmatpush1.bf16.msra.mxu1 %v3783_v42  ;;  %v3870_v40 = vld [vmem:[%s4626_s17 + $0x340] ss:$16 sps:$4 sm:$0xff]   ;;  %v3878_v42 = vld [vmem:[%s4626_s17 + $0x364] ss:$16 sps:$4 sm:$0xff]  }
 0x1b1   : > { %2390 = vmatprep.subr.bf16.mxu0 %v3784_v43  ;;  %2554 = vmatprep.subr.bf16.mxu1 %v3786_v44  ;;  %v3881_v43 = vld [vmem:[%s4626_s17 + $0x36c] ss:$16 sps:$4 sm:$0xff]   ;;  %v3876_v44 = vld [vmem:[%s4626_s17 + $0x360] ss:$16 sps:$4 sm:$0xff]  }
 0x1b4   : > { %2391 = vmatpush1.bf16.msra.mxu0 %v3788_v45  ;;  %2555 = vmatpush1.bf16.msra.mxu1 %v3789_v46  ;;  %v3879_v45 = vld [vmem:[%s4626_s17 + $0x368] ss:$16 sps:$4 sm:$0xff]   ;;  %v3884_v46 = vld [vmem:[%s4626_s17 + $0x384] ss:$16 sps:$4 sm:$0xff]  }
 0x1b5   : > { %2392 = vmatprep.subr.bf16.mxu0 %v3790_v47  ;;  %2556 = vmatprep.subr.bf16.mxu1 %v3792_v48  ;;  %v3887_v47 = vld [vmem:[%s4626_s17 + $0x38c] ss:$16 sps:$4 sm:$0xff]   ;;  %v3882_v48 = vld [vmem:[%s4626_s17 + $0x380] ss:$16 sps:$4 sm:$0xff]  }
 0x1b8   : > { %2393 = vmatpush1.bf16.msra.mxu0 %v3794_v49  ;;  %2557 = vmatpush1.bf16.msra.mxu1 %v3795_v50  ;;  %v3885_v49 = vld [vmem:[%s4626_s17 + $0x388] ss:$16 sps:$4 sm:$0xff]   ;;  %v3890_v50 = vld [vmem:[%s4626_s17 + $0x3a4] ss:$16 sps:$4 sm:$0xff]  }
 0x1b9   : > { %2394 = vmatprep.subr.bf16.mxu0 %v3796_v51  ;;  %2558 = vmatprep.subr.bf16.mxu1 %v3798_v52  ;;  %v3893_v51 = vld [vmem:[%s4626_s17 + $0x3ac] ss:$16 sps:$4 sm:$0xff]   ;;  %v3888_v52 = vld [vmem:[%s4626_s17 + $0x3a0] ss:$16 sps:$4 sm:$0xff]  }
 0x1bc   : > { %2395 = vmatpush1.bf16.msra.mxu0 %v3800_v53  ;;  %2559 = vmatpush1.bf16.msra.mxu1 %v3801_v54  ;;  %v3891_v53 = vld [vmem:[%s4626_s17 + $0x3a8] ss:$16 sps:$4 sm:$0xff]   ;;  %v3896_v54 = vld [vmem:[%s4626_s17 + $0x3c4] ss:$16 sps:$4 sm:$0xff]  }
 0x1bd   : > { %2396 = vmatprep.subr.bf16.mxu0 %v3802_v55  ;;  %2560 = vmatprep.subr.bf16.mxu1 %v3804_v56  ;;  %v3899_v55 = vld [vmem:[%s4626_s17 + $0x3cc] ss:$16 sps:$4 sm:$0xff]   ;;  %v3894_v56 = vld [vmem:[%s4626_s17 + $0x3c0] ss:$16 sps:$4 sm:$0xff]  }
 0x1c0   : > { %2397 = vmatpush1.bf16.msra.mxu0 %v3806_v57  ;;  %2561 = vmatpush1.bf16.msra.mxu1 %v3807_v58  ;;  %v3897_v57 = vld [vmem:[%s4626_s17 + $0x3c8] ss:$16 sps:$4 sm:$0xff]   ;;  %v3902_v58 = vld [vmem:[%s4626_s17 + $0x3e4] ss:$16 sps:$4 sm:$0xff]  }
 0x1c1   : > { %2407 = vmatprep.subr.bf16.mxu0 %v3812_v59  ;;  %2571 = vmatprep.subr.bf16.mxu1 %v3815_v60  ;;  %v3905_v59 = vld [vmem:[%s4626_s17 + $0x3ec] ss:$16 sps:$4 sm:$0xff]   ;;  %v3900_v60 = vld [vmem:[%s4626_s17 + $0x3e0] ss:$16 sps:$4 sm:$0xff]  }
 0x1c3   : > { %2399 = vmatmul.mubr.bf16.vlgmr.msra.gmra.mrb[0].mxu0 %v3233_v61  ;;  %2563 = vmatmul.mubr.bf16.vlgmr.msra.gmra.mrb[0].mxu1 %v3233_v61  ;;  %v3903_v61 = vld [vmem:[%s4626_s17 + $0x3e8] ss:$16 sps:$4 sm:$0xff]  }
 0x1c4   : > { %2408 = vmatpush1.bf16.msra.mxu0 %v3810_v62  ;;  %2572 = vmatpush1.bf16.msra.mxu1 %v3813_v63  ;;  %v3910_v62 = vld [vmem:[%s4626_s17 + $0x404] ss:$16 sps:$4 sm:$0xff]   ;;  %v3913_v63 = vld [vmem:[%s4626_s17 + $0x40c] ss:$16 sps:$4 sm:$0xff]  }
 0x1c5   : > { %2409 = vmatprep.subr.bf16.mxu0 %v3818_v0  ;;  %2573 = vmatprep.subr.bf16.mxu1 %v3821_v1  ;;  %v3235_v0 = vcombine.low %v4747_v22, %v4747_v22  ;;  %v3908_v1 = vld [vmem:[%s4626_s17 + $0x400] ss:$16 sps:$4 sm:$0xff]   ;;  %v3943_v22 = vld [vmem:[%s4626_s17 + $0x4ac] ss:$16 sps:$4 sm:$0xff]  }
 0x1c6   : > { %2439 = vmatprep.mubr.bf16.mxu0 %v3236_v23  ;;  %2603 = vmatprep.mubr.bf16.mxu1 %v3236_v23  ;;  %v3938_v23 = vld [vmem:[%s4626_s17 + $0x4a0] ss:$16 sps:$4 sm:$0xff]  }
 0x1c8   : > { %2410 = vmatpush1.bf16.msra.mxu0 %v3816_v2  ;;  %2574 = vmatpush1.bf16.msra.mxu1 %v3819_v3  ;;  %v3911_v2 = vld [vmem:[%s4626_s17 + $0x408] ss:$16 sps:$4 sm:$0xff]   ;;  %v3916_v3 = vld [vmem:[%s4626_s17 + $0x424] ss:$16 sps:$4 sm:$0xff]  }
 0x1c9   : > { %2411 = vmatprep.subr.bf16.mxu0 %v3824_v4  ;;  %2575 = vmatprep.subr.bf16.mxu1 %v3827_v5  ;;  %v4796_v4 = vld [vmem:[#allocation2 + $0x10] sm:$0xff]  ;;  %v3919_v5 = vld [vmem:[%s4626_s17 + $0x42c] ss:$16 sps:$4 sm:$0xff]  }
 0x1cc   : > { %2412 = vmatpush1.bf16.msra.mxu0 %v3822_v6  ;;  %2576 = vmatpush1.bf16.msra.mxu1 %v3825_v7  ;;  %v3238_v6 = vcombine.high %v4796_v4, %v4796_v4  ;;  %v3914_v7 = vld [vmem:[%s4626_s17 + $0x420] ss:$16 sps:$4 sm:$0xff]  }
 0x1cd   : > { %2413 = vmatprep.subr.bf16.mxu0 %v3830_v8  ;;  %2577 = vmatprep.subr.bf16.mxu1 %v3833_v9  ;;  %v3917_v8 = vld [vmem:[%s4626_s17 + $0x428] ss:$16 sps:$4 sm:$0xff]   ;;  %v3922_v9 = vld [vmem:[%s4626_s17 + $0x444] ss:$16 sps:$4 sm:$0xff]  }
 0x1d0   : > { %2414 = vmatpush1.bf16.msra.mxu0 %v3828_v10  ;;  %2578 = vmatpush1.bf16.msra.mxu1 %v3831_v11  ;;  %v3925_v10 = vld [vmem:[%s4626_s17 + $0x44c] ss:$16 sps:$4 sm:$0xff]   ;;  %v3920_v11 = vld [vmem:[%s4626_s17 + $0x440] ss:$16 sps:$4 sm:$0xff]  }
 0x1d1   : > { %2415 = vmatprep.subr.bf16.mxu0 %v3836_v12  ;;  %2579 = vmatprep.subr.bf16.mxu1 %v3839_v13  ;;  %v3923_v12 = vld [vmem:[%s4626_s17 + $0x448] ss:$16 sps:$4 sm:$0xff]   ;;  %v3928_v13 = vld [vmem:[%s4626_s17 + $0x464] ss:$16 sps:$4 sm:$0xff]  }
 0x1d4   : > { %2416 = vmatpush1.bf16.msra.mxu0 %v3834_v14  ;;  %2580 = vmatpush1.bf16.msra.mxu1 %v3837_v15  ;;  %v3931_v14 = vld [vmem:[%s4626_s17 + $0x46c] ss:$16 sps:$4 sm:$0xff]   ;;  %v3926_v15 = vld [vmem:[%s4626_s17 + $0x460] ss:$16 sps:$4 sm:$0xff]  }
 0x1d5   : > { %2417 = vmatprep.subr.bf16.mxu0 %v3842_v16  ;;  %2581 = vmatprep.subr.bf16.mxu1 %v3845_v17  ;;  %v3929_v16 = vld [vmem:[%s4626_s17 + $0x468] ss:$16 sps:$4 sm:$0xff]   ;;  %v3934_v17 = vld [vmem:[%s4626_s17 + $0x484] ss:$16 sps:$4 sm:$0xff]  }
 0x1d8   : > { %2418 = vmatpush1.bf16.msra.mxu0 %v3840_v18  ;;  %2582 = vmatpush1.bf16.msra.mxu1 %v3843_v19  ;;  %v3937_v18 = vld [vmem:[%s4626_s17 + $0x48c] ss:$16 sps:$4 sm:$0xff]   ;;  %v3932_v19 = vld [vmem:[%s4626_s17 + $0x480] ss:$16 sps:$4 sm:$0xff]  }
 0x1d9   : > { %2419 = vmatprep.subr.bf16.mxu0 %v3848_v20  ;;  %2583 = vmatprep.subr.bf16.mxu1 %v3851_v21  ;;  %v3935_v20 = vld [vmem:[%s4626_s17 + $0x488] ss:$16 sps:$4 sm:$0xff]   ;;  %v3940_v21 = vld [vmem:[%s4626_s17 + $0x4a4] ss:$16 sps:$4 sm:$0xff]  }
 0x1dc   : > { %2420 = vmatpush1.bf16.msra.mxu0 %v3846_v24  ;;  %2584 = vmatpush1.bf16.msra.mxu1 %v3849_v25  ;;  %v3941_v24 = vld [vmem:[%s4626_s17 + $0x4a8] ss:$16 sps:$4 sm:$0xff]   ;;  %v3946_v25 = vld [vmem:[%s4626_s17 + $0x4c4] ss:$16 sps:$4 sm:$0xff]  }
 0x1dd   : > { %2421 = vmatprep.subr.bf16.mxu0 %v3854_v26  ;;  %2585 = vmatprep.subr.bf16.mxu1 %v3857_v27  ;;  %v3949_v26 = vld [vmem:[%s4626_s17 + $0x4cc] ss:$16 sps:$4 sm:$0xff]   ;;  %v3944_v27 = vld [vmem:[%s4626_s17 + $0x4c0] ss:$16 sps:$4 sm:$0xff]  }
 0x1e0   : > { %2422 = vmatpush1.bf16.msra.mxu0 %v3852_v28  ;;  %2586 = vmatpush1.bf16.msra.mxu1 %v3855_v29  ;;  %v3947_v28 = vld [vmem:[%s4626_s17 + $0x4c8] ss:$16 sps:$4 sm:$0xff]   ;;  %v3952_v29 = vld [vmem:[%s4626_s17 + $0x4e4] ss:$16 sps:$4 sm:$0xff]  }
 0x1e1   : > { %2423 = vmatprep.subr.bf16.mxu0 %v3860_v30  ;;  %2587 = vmatprep.subr.bf16.mxu1 %v3863_v31  ;;  %v3955_v30 = vld [vmem:[%s4626_s17 + $0x4ec] ss:$16 sps:$4 sm:$0xff]   ;;  %v3950_v31 = vld [vmem:[%s4626_s17 + $0x4e0] ss:$16 sps:$4 sm:$0xff]  }
 0x1e4   : > { %2424 = vmatpush1.bf16.msra.mxu0 %v3858_v32  ;;  %2588 = vmatpush1.bf16.msra.mxu1 %v3861_v33  ;;  %v3953_v32 = vld [vmem:[%s4626_s17 + $0x4e8] ss:$16 sps:$4 sm:$0xff]   ;;  %v3958_v33 = vld [vmem:[%s4626_s17 + $0x504] ss:$16 sps:$4 sm:$0xff]  }
 0x1e5   : > { %2425 = vmatprep.subr.bf16.mxu0 %v3866_v34  ;;  %2589 = vmatprep.subr.bf16.mxu1 %v3869_v35  ;;  %v3961_v34 = vld [vmem:[%s4626_s17 + $0x50c] ss:$16 sps:$4 sm:$0xff]   ;;  %v3956_v35 = vld [vmem:[%s4626_s17 + $0x500] ss:$16 sps:$4 sm:$0xff]  }
 0x1e8   : > { %2426 = vmatpush1.bf16.msra.mxu0 %v3864_v36  ;;  %2590 = vmatpush1.bf16.msra.mxu1 %v3867_v37  ;;  %v3959_v36 = vld [vmem:[%s4626_s17 + $0x508] ss:$16 sps:$4 sm:$0xff]   ;;  %v3964_v37 = vld [vmem:[%s4626_s17 + $0x524] ss:$16 sps:$4 sm:$0xff]  }
 0x1e9   : > { %2427 = vmatprep.subr.bf16.mxu0 %v3872_v38  ;;  %2591 = vmatprep.subr.bf16.mxu1 %v3875_v39  ;;  %v3967_v38 = vld [vmem:[%s4626_s17 + $0x52c] ss:$16 sps:$4 sm:$0xff]   ;;  %v3962_v39 = vld [vmem:[%s4626_s17 + $0x520] ss:$16 sps:$4 sm:$0xff]  }
 0x1ec   : > { %2428 = vmatpush1.bf16.msra.mxu0 %v3870_v40  ;;  %2592 = vmatpush1.bf16.msra.mxu1 %v3873_v41  ;;  %v3965_v40 = vld [vmem:[%s4626_s17 + $0x528] ss:$16 sps:$4 sm:$0xff]   ;;  %v3970_v41 = vld [vmem:[%s4626_s17 + $0x544] ss:$16 sps:$4 sm:$0xff]  }
 0x1ed   : > { %2429 = vmatprep.subr.bf16.mxu0 %v3878_v42  ;;  %2593 = vmatprep.subr.bf16.mxu1 %v3881_v43  ;;  %v3973_v42 = vld [vmem:[%s4626_s17 + $0x54c] ss:$16 sps:$4 sm:$0xff]   ;;  %v3968_v43 = vld [vmem:[%s4626_s17 + $0x540] ss:$16 sps:$4 sm:$0xff]  }
 0x1f0   : > { %2430 = vmatpush1.bf16.msra.mxu0 %v3876_v44  ;;  %2594 = vmatpush1.bf16.msra.mxu1 %v3879_v45  ;;  %v3971_v44 = vld [vmem:[%s4626_s17 + $0x548] ss:$16 sps:$4 sm:$0xff]   ;;  %v3976_v45 = vld [vmem:[%s4626_s17 + $0x564] ss:$16 sps:$4 sm:$0xff]  }
 0x1f1   : > { %2431 = vmatprep.subr.bf16.mxu0 %v3884_v46  ;;  %2595 = vmatprep.subr.bf16.mxu1 %v3887_v47  ;;  %v3979_v46 = vld [vmem:[%s4626_s17 + $0x56c] ss:$16 sps:$4 sm:$0xff]   ;;  %v3974_v47 = vld [vmem:[%s4626_s17 + $0x560] ss:$16 sps:$4 sm:$0xff]  }
 0x1f4   : > { %2432 = vmatpush1.bf16.msra.mxu0 %v3882_v48  ;;  %2596 = vmatpush1.bf16.msra.mxu1 %v3885_v49  ;;  %v3977_v48 = vld [vmem:[%s4626_s17 + $0x568] ss:$16 sps:$4 sm:$0xff]   ;;  %v3982_v49 = vld [vmem:[%s4626_s17 + $0x584] ss:$16 sps:$4 sm:$0xff]  }
 0x1f5   : > { %2433 = vmatprep.subr.bf16.mxu0 %v3890_v50  ;;  %2597 = vmatprep.subr.bf16.mxu1 %v3893_v51  ;;  %v3985_v50 = vld [vmem:[%s4626_s17 + $0x58c] ss:$16 sps:$4 sm:$0xff]   ;;  %v3980_v51 = vld [vmem:[%s4626_s17 + $0x580] ss:$16 sps:$4 sm:$0xff]  }
 0x1f8   : > { %2434 = vmatpush1.bf16.msra.mxu0 %v3888_v52  ;;  %2598 = vmatpush1.bf16.msra.mxu1 %v3891_v53  ;;  %v3983_v52 = vld [vmem:[%s4626_s17 + $0x588] ss:$16 sps:$4 sm:$0xff]   ;;  %v3988_v53 = vld [vmem:[%s4626_s17 + $0x5a4] ss:$16 sps:$4 sm:$0xff]  }
 0x1f9   : > { %2435 = vmatprep.subr.bf16.mxu0 %v3896_v54  ;;  %2599 = vmatprep.subr.bf16.mxu1 %v3899_v55  ;;  %v3991_v54 = vld [vmem:[%s4626_s17 + $0x5ac] ss:$16 sps:$4 sm:$0xff]   ;;  %v3986_v55 = vld [vmem:[%s4626_s17 + $0x5a0] ss:$16 sps:$4 sm:$0xff]  }
 0x1fc   : > { %2436 = vmatpush1.bf16.msra.mxu0 %v3894_v56  ;;  %2600 = vmatpush1.bf16.msra.mxu1 %v3897_v57  ;;  %v3989_v56 = vld [vmem:[%s4626_s17 + $0x5a8] ss:$16 sps:$4 sm:$0xff]   ;;  %v3994_v57 = vld [vmem:[%s4626_s17 + $0x5c4] ss:$16 sps:$4 sm:$0xff]  }
 0x1fd   : > { %2437 = vmatprep.subr.bf16.mxu0 %v3902_v58  ;;  %2601 = vmatprep.subr.bf16.mxu1 %v3905_v59  ;;  %v3997_v58 = vld [vmem:[%s4626_s17 + $0x5cc] ss:$16 sps:$4 sm:$0xff]   ;;  %v3992_v59 = vld [vmem:[%s4626_s17 + $0x5c0] ss:$16 sps:$4 sm:$0xff]  }
 0x200   : > { %2438 = vmatpush1.bf16.msra.mxu0 %v3900_v60  ;;  %2602 = vmatpush1.bf16.msra.mxu1 %v3903_v61  ;;  %v3995_v60 = vld [vmem:[%s4626_s17 + $0x5c8] ss:$16 sps:$4 sm:$0xff]   ;;  %v4000_v61 = vld [vmem:[%s4626_s17 + $0x5e4] ss:$16 sps:$4 sm:$0xff]  }
 0x201   : > { %2448 = vmatprep.subr.bf16.mxu0 %v3910_v62  ;;  %2612 = vmatprep.subr.bf16.mxu1 %v3913_v63  ;;  %v4003_v62 = vld [vmem:[%s4626_s17 + $0x5ec] ss:$16 sps:$4 sm:$0xff]   ;;  %v3998_v63 = vld [vmem:[%s4626_s17 + $0x5e0] ss:$16 sps:$4 sm:$0xff]  }
 0x203   : > { %2440 = vmatmul.mubr.bf16.vlgmr.msra.gmra.mrb[0].mxu0 %v3235_v0  ;;  %2604 = vmatmul.mubr.bf16.vlgmr.msra.gmra.mrb[0].mxu1 %v3235_v0  ;;  %v4001_v0 = vld [vmem:[%s4626_s17 + $0x5e8] ss:$16 sps:$4 sm:$0xff]  }
 0x204   : > { %2449 = vmatpush1.bf16.msra.mxu0 %v3908_v1  ;;  %2613 = vmatpush1.bf16.msra.mxu1 %v3911_v2  ;;  %v4008_v1 = vld [vmem:[%s4626_s17 + $0x604] ss:$16 sps:$4 sm:$0xff]   ;;  %v4011_v2 = vld [vmem:[%s4626_s17 + $0x60c] ss:$16 sps:$4 sm:$0xff]  }
 0x205   : > { %2450 = vmatprep.subr.bf16.mxu0 %v3916_v3  ;;  %2614 = vmatprep.subr.bf16.mxu1 %v3919_v5  ;;  %v4006_v3 = vld [vmem:[%s4626_s17 + $0x600] ss:$16 sps:$4 sm:$0xff]   ;;  %v4009_v5 = vld [vmem:[%s4626_s17 + $0x608] ss:$16 sps:$4 sm:$0xff]  }
 0x206   : > { %2480 = vmatprep.mubr.bf16.mxu0 %v3238_v6  ;;  %2644 = vmatprep.mubr.bf16.mxu1 %v3238_v6  ;;  %v3237_v6 = vcombine.low %v4796_v4, %v4796_v4  ;;  %v4020_v4 = vld [vmem:[%s4626_s17 + $0x644] ss:$16 sps:$4 sm:$0xff]  }
 0x208   : > { %2451 = vmatpush1.bf16.msra.mxu0 %v3914_v7  ;;  %2615 = vmatpush1.bf16.msra.mxu1 %v3917_v8  ;;  %v4873_v7 = vld [vmem:[#allocation2 + $0x18] sm:$0xff]  ;;  %v4014_v8 = vld [vmem:[%s4626_s17 + $0x624] ss:$16 sps:$4 sm:$0xff]  }
 0x209   : > { %2452 = vmatprep.subr.bf16.mxu0 %v3922_v9  ;;  %2616 = vmatprep.subr.bf16.mxu1 %v3925_v10  ;;  %v4017_v9 = vld [vmem:[%s4626_s17 + $0x62c] ss:$16 sps:$4 sm:$0xff]   ;;  %v4012_v10 = vld [vmem:[%s4626_s17 + $0x620] ss:$16 sps:$4 sm:$0xff]  }
 0x20c   : > { %2453 = vmatpush1.bf16.msra.mxu0 %v3920_v11  ;;  %2617 = vmatpush1.bf16.msra.mxu1 %v3923_v12  ;;  %v4015_v11 = vld [vmem:[%s4626_s17 + $0x628] ss:$16 sps:$4 sm:$0xff]   ;;  %v3240_v12 = vcombine.high %v4873_v7, %v4873_v7 }
 0x20d   : > { %2454 = vmatprep.subr.bf16.mxu0 %v3928_v13  ;;  %2618 = vmatprep.subr.bf16.mxu1 %v3931_v14  ;;  %v4023_v13 = vld [vmem:[%s4626_s17 + $0x64c] ss:$16 sps:$4 sm:$0xff]   ;;  %v4018_v14 = vld [vmem:[%s4626_s17 + $0x640] ss:$16 sps:$4 sm:$0xff]  }
 0x210   : > { %2455 = vmatpush1.bf16.msra.mxu0 %v3926_v15  ;;  %2619 = vmatpush1.bf16.msra.mxu1 %v3929_v16  ;;  %v4021_v15 = vld [vmem:[%s4626_s17 + $0x648] ss:$16 sps:$4 sm:$0xff]   ;;  %v4026_v16 = vld [vmem:[%s4626_s17 + $0x664] ss:$16 sps:$4 sm:$0xff]  }
 0x211   : > { %2456 = vmatprep.subr.bf16.mxu0 %v3934_v17  ;;  %2620 = vmatprep.subr.bf16.mxu1 %v3937_v18  ;;  %v4029_v17 = vld [vmem:[%s4626_s17 + $0x66c] ss:$16 sps:$4 sm:$0xff]   ;;  %v4024_v18 = vld [vmem:[%s4626_s17 + $0x660] ss:$16 sps:$4 sm:$0xff]  }
 0x214   : > { %2457 = vmatpush1.bf16.msra.mxu0 %v3932_v19  ;;  %2621 = vmatpush1.bf16.msra.mxu1 %v3935_v20  ;;  %v4027_v19 = vld [vmem:[%s4626_s17 + $0x668] ss:$16 sps:$4 sm:$0xff]   ;;  %v4032_v20 = vld [vmem:[%s4626_s17 + $0x684] ss:$16 sps:$4 sm:$0xff]  }
 0x215   : > { %2458 = vmatprep.subr.bf16.mxu0 %v3940_v21  ;;  %2622 = vmatprep.subr.bf16.mxu1 %v3943_v22  ;;  %v4035_v21 = vld [vmem:[%s4626_s17 + $0x68c] ss:$16 sps:$4 sm:$0xff]   ;;  %v4030_v22 = vld [vmem:[%s4626_s17 + $0x680] ss:$16 sps:$4 sm:$0xff]  }
 0x218   : > { %2459 = vmatpush1.bf16.msra.mxu0 %v3938_v23  ;;  %2623 = vmatpush1.bf16.msra.mxu1 %v3941_v24  ;;  %v4033_v23 = vld [vmem:[%s4626_s17 + $0x688] ss:$16 sps:$4 sm:$0xff]   ;;  %v4038_v24 = vld [vmem:[%s4626_s17 + $0x6a4] ss:$16 sps:$4 sm:$0xff]  }
 0x219   : > { %2460 = vmatprep.subr.bf16.mxu0 %v3946_v25  ;;  %2624 = vmatprep.subr.bf16.mxu1 %v3949_v26  ;;  %v4041_v25 = vld [vmem:[%s4626_s17 + $0x6ac] ss:$16 sps:$4 sm:$0xff]   ;;  %v4036_v26 = vld [vmem:[%s4626_s17 + $0x6a0] ss:$16 sps:$4 sm:$0xff]  }
 0x21c   : > { %2461 = vmatpush1.bf16.msra.mxu0 %v3944_v27  ;;  %2625 = vmatpush1.bf16.msra.mxu1 %v3947_v28  ;;  %v4039_v27 = vld [vmem:[%s4626_s17 + $0x6a8] ss:$16 sps:$4 sm:$0xff]   ;;  %v4044_v28 = vld [vmem:[%s4626_s17 + $0x6c4] ss:$16 sps:$4 sm:$0xff]  }
 0x21d   : > { %2462 = vmatprep.subr.bf16.mxu0 %v3952_v29  ;;  %2626 = vmatprep.subr.bf16.mxu1 %v3955_v30  ;;  %v4047_v29 = vld [vmem:[%s4626_s17 + $0x6cc] ss:$16 sps:$4 sm:$0xff]   ;;  %v4042_v30 = vld [vmem:[%s4626_s17 + $0x6c0] ss:$16 sps:$4 sm:$0xff]  }
 0x220   : > { %2463 = vmatpush1.bf16.msra.mxu0 %v3950_v31  ;;  %2627 = vmatpush1.bf16.msra.mxu1 %v3953_v32  ;;  %v4045_v31 = vld [vmem:[%s4626_s17 + $0x6c8] ss:$16 sps:$4 sm:$0xff]   ;;  %v4050_v32 = vld [vmem:[%s4626_s17 + $0x6e4] ss:$16 sps:$4 sm:$0xff]  }
 0x221   : > { %2464 = vmatprep.subr.bf16.mxu0 %v3958_v33  ;;  %2628 = vmatprep.subr.bf16.mxu1 %v3961_v34  ;;  %v4053_v33 = vld [vmem:[%s4626_s17 + $0x6ec] ss:$16 sps:$4 sm:$0xff]   ;;  %v4048_v34 = vld [vmem:[%s4626_s17 + $0x6e0] ss:$16 sps:$4 sm:$0xff]  }
 0x224   : > { %2465 = vmatpush1.bf16.msra.mxu0 %v3956_v35  ;;  %2629 = vmatpush1.bf16.msra.mxu1 %v3959_v36  ;;  %v4051_v35 = vld [vmem:[%s4626_s17 + $0x6e8] ss:$16 sps:$4 sm:$0xff]   ;;  %v4056_v36 = vld [vmem:[%s4626_s17 + $0x704] ss:$16 sps:$4 sm:$0xff]  }
 0x225   : > { %2466 = vmatprep.subr.bf16.mxu0 %v3964_v37  ;;  %2630 = vmatprep.subr.bf16.mxu1 %v3967_v38  ;;  %v4059_v37 = vld [vmem:[%s4626_s17 + $0x70c] ss:$16 sps:$4 sm:$0xff]   ;;  %v4054_v38 = vld [vmem:[%s4626_s17 + $0x700] ss:$16 sps:$4 sm:$0xff]  }
 0x228   : > { %2467 = vmatpush1.bf16.msra.mxu0 %v3962_v39  ;;  %2631 = vmatpush1.bf16.msra.mxu1 %v3965_v40  ;;  %v4057_v39 = vld [vmem:[%s4626_s17 + $0x708] ss:$16 sps:$4 sm:$0xff]   ;;  %v4062_v40 = vld [vmem:[%s4626_s17 + $0x724] ss:$16 sps:$4 sm:$0xff]  }
 0x229   : > { %2468 = vmatprep.subr.bf16.mxu0 %v3970_v41  ;;  %2632 = vmatprep.subr.bf16.mxu1 %v3973_v42  ;;  %v4065_v41 = vld [vmem:[%s4626_s17 + $0x72c] ss:$16 sps:$4 sm:$0xff]   ;;  %v4060_v42 = vld [vmem:[%s4626_s17 + $0x720] ss:$16 sps:$4 sm:$0xff]  }
 0x22c   : > { %2469 = vmatpush1.bf16.msra.mxu0 %v3968_v43  ;;  %2633 = vmatpush1.bf16.msra.mxu1 %v3971_v44  ;;  %v4063_v43 = vld [vmem:[%s4626_s17 + $0x728] ss:$16 sps:$4 sm:$0xff]   ;;  %v4068_v44 = vld [vmem:[%s4626_s17 + $0x744] ss:$16 sps:$4 sm:$0xff]  }
 0x22d   : > { %2470 = vmatprep.subr.bf16.mxu0 %v3976_v45  ;;  %2634 = vmatprep.subr.bf16.mxu1 %v3979_v46  ;;  %v4071_v45 = vld [vmem:[%s4626_s17 + $0x74c] ss:$16 sps:$4 sm:$0xff]   ;;  %v4066_v46 = vld [vmem:[%s4626_s17 + $0x740] ss:$16 sps:$4 sm:$0xff]  }
 0x230   : > { %2471 = vmatpush1.bf16.msra.mxu0 %v3974_v47  ;;  %2635 = vmatpush1.bf16.msra.mxu1 %v3977_v48  ;;  %v4069_v47 = vld [vmem:[%s4626_s17 + $0x748] ss:$16 sps:$4 sm:$0xff]   ;;  %v4074_v48 = vld [vmem:[%s4626_s17 + $0x764] ss:$16 sps:$4 sm:$0xff]  }
 0x231   : > { %2472 = vmatprep.subr.bf16.mxu0 %v3982_v49  ;;  %2636 = vmatprep.subr.bf16.mxu1 %v3985_v50  ;;  %v4077_v49 = vld [vmem:[%s4626_s17 + $0x76c] ss:$16 sps:$4 sm:$0xff]   ;;  %v4072_v50 = vld [vmem:[%s4626_s17 + $0x760] ss:$16 sps:$4 sm:$0xff]  }
 0x234   : > { %2473 = vmatpush1.bf16.msra.mxu0 %v3980_v51  ;;  %2637 = vmatpush1.bf16.msra.mxu1 %v3983_v52  ;;  %v4075_v51 = vld [vmem:[%s4626_s17 + $0x768] ss:$16 sps:$4 sm:$0xff]   ;;  %v4080_v52 = vld [vmem:[%s4626_s17 + $0x784] ss:$16 sps:$4 sm:$0xff]  }
 0x235   : > { %2474 = vmatprep.subr.bf16.mxu0 %v3988_v53  ;;  %2638 = vmatprep.subr.bf16.mxu1 %v3991_v54  ;;  %v4083_v53 = vld [vmem:[%s4626_s17 + $0x78c] ss:$16 sps:$4 sm:$0xff]   ;;  %v4078_v54 = vld [vmem:[%s4626_s17 + $0x780] ss:$16 sps:$4 sm:$0xff]  }
 0x238   : > { %2475 = vmatpush1.bf16.msra.mxu0 %v3986_v55  ;;  %2639 = vmatpush1.bf16.msra.mxu1 %v3989_v56  ;;  %v4081_v55 = vld [vmem:[%s4626_s17 + $0x788] ss:$16 sps:$4 sm:$0xff]   ;;  %v4086_v56 = vld [vmem:[%s4626_s17 + $0x7a4] ss:$16 sps:$4 sm:$0xff]  }
 0x239   : > { %2476 = vmatprep.subr.bf16.mxu0 %v3994_v57  ;;  %2640 = vmatprep.subr.bf16.mxu1 %v3997_v58  ;;  %v4089_v57 = vld [vmem:[%s4626_s17 + $0x7ac] ss:$16 sps:$4 sm:$0xff]   ;;  %v4084_v58 = vld [vmem:[%s4626_s17 + $0x7a0] ss:$16 sps:$4 sm:$0xff]  }
 0x23c   : > { %2477 = vmatpush1.bf16.msra.mxu0 %v3992_v59  ;;  %2641 = vmatpush1.bf16.msra.mxu1 %v3995_v60  ;;  %v4087_v59 = vld [vmem:[%s4626_s17 + $0x7a8] ss:$16 sps:$4 sm:$0xff]   ;;  %v4092_v60 = vld [vmem:[%s4626_s17 + $0x7c4] ss:$16 sps:$4 sm:$0xff]  }
 0x23d   : > { %2478 = vmatprep.subr.bf16.mxu0 %v4000_v61  ;;  %2642 = vmatprep.subr.bf16.mxu1 %v4003_v62  ;;  %v4095_v61 = vld [vmem:[%s4626_s17 + $0x7cc] ss:$16 sps:$4 sm:$0xff]   ;;  %v4090_v62 = vld [vmem:[%s4626_s17 + $0x7c0] ss:$16 sps:$4 sm:$0xff]  }
 0x240   : > { %2479 = vmatpush1.bf16.msra.mxu0 %v3998_v63  ;;  %2643 = vmatpush1.bf16.msra.mxu1 %v4001_v0  ;;  %v4093_v63 = vld [vmem:[%s4626_s17 + $0x7c8] ss:$16 sps:$4 sm:$0xff]   ;;  %v4098_v0 = vld [vmem:[%s4626_s17 + $0x7e4] ss:$16 sps:$4 sm:$0xff]  }
 0x241   : > { %2489 = vmatprep.subr.bf16.mxu0 %v4008_v1  ;;  %2653 = vmatprep.subr.bf16.mxu1 %v4011_v2  ;;  %v4101_v1 = vld [vmem:[%s4626_s17 + $0x7ec] ss:$16 sps:$4 sm:$0xff]   ;;  %v4096_v2 = vld [vmem:[%s4626_s17 + $0x7e0] ss:$16 sps:$4 sm:$0xff]  }
 0x243   : > { %2481 = vmatmul.mubr.bf16.vlgmr.msra.gmra.mrb[0].mxu0 %v3237_v6  ;;  %2645 = vmatmul.mubr.bf16.vlgmr.msra.gmra.mrb[0].mxu1 %v3237_v6  ;;  %v4105_v6 = vld [vmem:[%s4849_s20 + $0xc0] sm:$0xff]  }
 0x244   : > { %2490 = vmatpush1.bf16.msra.mxu0 %v4006_v3  ;;  %2654 = vmatpush1.bf16.msra.mxu1 %v4009_v5  ;;  %v4099_v3 = vld [vmem:[%s4626_s17 + $0x7e8] ss:$16 sps:$4 sm:$0xff]  }
 0x245   : > { %2491 = vmatprep.subr.bf16.mxu0 %v4014_v8  ;;  %2655 = vmatprep.subr.bf16.mxu1 %v4017_v9  ;;  %v4104_v5 = vld [vmem:[%s4849_s20 + $0x40] sm:$0xff]   ;;  %v3239_v8 = vcombine.low %v4873_v7, %v4873_v7  ;;  %v4111_v7 = vld [vmem:[%s4849_s20 + $0x88] sm:$0xff]  }
 0x246   : > { %2521 = vmatprep.mubr.bf16.mxu0 %v3240_v12  ;;  %2685 = vmatprep.mubr.bf16.mxu1 %v3240_v12  ;;  %v4106_v9 = vld [vmem:[%s4849_s20] sm:$0xff]   ;;  %v4109_v12 = vld [vmem:[%s4849_s20 + $0xc8] sm:$0xff]  }
 0x248   : > { %2492 = vmatpush1.bf16.msra.mxu0 %v4012_v10  ;;  %2656 = vmatpush1.bf16.msra.mxu1 %v4015_v11  ;;  %v4107_v10 = vld [vmem:[%s4849_s20 + $0x80] sm:$0xff]   ;;  %v4108_v11 = vld [vmem:[%s4849_s20 + $0x48] sm:$0xff]  }
 0x249   : > { %2493 = vmatprep.subr.bf16.mxu0 %v4020_v4  ;;  %2657 = vmatprep.subr.bf16.mxu1 %v4023_v13  ;;  %v4110_v4 = vld [vmem:[%s4849_s20 + $0x8] sm:$0xff]   ;;  %v4112_v13 = vld [vmem:[%s4849_s20 + $0x50] sm:$0xff]  }
 0x24c   : > { %2494 = vmatpush1.bf16.msra.mxu0 %v4018_v14  ;;  %2658 = vmatpush1.bf16.msra.mxu1 %v4021_v15  ;;  %v4113_v14 = vld [vmem:[%s4849_s20 + $0xd0] sm:$0xff]  }
 0x24d   : > { %2495 = vmatprep.subr.bf16.mxu0 %v4026_v16  ;;  %2659 = vmatprep.subr.bf16.mxu1 %v4029_v17  ;;  %v4114_v15 = vld [vmem:[%s4849_s20 + $0x10] sm:$0xff]   ;;  %v4116_v17 = vld [vmem:[%s4849_s20 + $0x58] sm:$0xff]  }
 0x24e   : > { %v4115_v16 = vld [vmem:[%s4849_s20 + $0x90] sm:$0xff]  }
 0x250   : > { %2496 = vmatpush1.bf16.msra.mxu0 %v4024_v18  ;;  %2660 = vmatpush1.bf16.msra.mxu1 %v4027_v19  ;;  %v4117_v18 = vld [vmem:[%s4849_s20 + $0xd8] sm:$0xff]  }
 0x251   : > { %2497 = vmatprep.subr.bf16.mxu0 %v4032_v20  ;;  %2661 = vmatprep.subr.bf16.mxu1 %v4035_v21  ;;  %v4118_v19 = vld [vmem:[%s4849_s20 + $0x18] sm:$0xff]   ;;  %v4120_v21 = vld [vmem:[%s4849_s20 + $0x60] sm:$0xff]  }
 0x252   : > { %v4119_v20 = vld [vmem:[%s4849_s20 + $0x98] sm:$0xff]  }
 0x254   : > { %2498 = vmatpush1.bf16.msra.mxu0 %v4030_v22  ;;  %2662 = vmatpush1.bf16.msra.mxu1 %v4033_v23  ;;  %v4121_v22 = vld [vmem:[%s4849_s20 + $0xe0] sm:$0xff]  }
 0x255   : > { %2499 = vmatprep.subr.bf16.mxu0 %v4038_v24  ;;  %2663 = vmatprep.subr.bf16.mxu1 %v4041_v25  ;;  %v4122_v23 = vld [vmem:[%s4849_s20 + $0x20] sm:$0xff]   ;;  %v4124_v25 = vld [vmem:[%s4849_s20 + $0x68] sm:$0xff]  }
 0x256   : > { %v4123_v24 = vld [vmem:[%s4849_s20 + $0xa0] sm:$0xff]  }
 0x258   : > { %2500 = vmatpush1.bf16.msra.mxu0 %v4036_v26  ;;  %2664 = vmatpush1.bf16.msra.mxu1 %v4039_v27  ;;  %v4125_v26 = vld [vmem:[%s4849_s20 + $0xe8] sm:$0xff]  }
 0x259   : > { %2501 = vmatprep.subr.bf16.mxu0 %v4044_v28  ;;  %2665 = vmatprep.subr.bf16.mxu1 %v4047_v29  ;;  %v4126_v27 = vld [vmem:[%s4849_s20 + $0x28] sm:$0xff]   ;;  %v4128_v29 = vld [vmem:[%s4849_s20 + $0x70] sm:$0xff]  }
 0x25a   : > { %v4127_v28 = vld [vmem:[%s4849_s20 + $0xa8] sm:$0xff]  }
 0x25c   : > { %2502 = vmatpush1.bf16.msra.mxu0 %v4042_v30  ;;  %2666 = vmatpush1.bf16.msra.mxu1 %v4045_v31  ;;  %v4129_v30 = vld [vmem:[%s4849_s20 + $0xf0] sm:$0xff]  }
 0x25d   : > { %2503 = vmatprep.subr.bf16.mxu0 %v4050_v32  ;;  %2667 = vmatprep.subr.bf16.mxu1 %v4053_v33  ;;  %v4130_v31 = vld [vmem:[%s4849_s20 + $0x30] sm:$0xff]   ;;  %v4132_v33 = vld [vmem:[%s4849_s20 + $0x78] sm:$0xff]  }
 0x25e   : > { %v4131_v32 = vld [vmem:[%s4849_s20 + $0xb0] sm:$0xff]  }
 0x260   : > { %2504 = vmatpush1.bf16.msra.mxu0 %v4048_v34  ;;  %2668 = vmatpush1.bf16.msra.mxu1 %v4051_v35  ;;  %v4133_v34 = vld [vmem:[%s4849_s20 + $0xf8] sm:$0xff]  }
 0x261   : > { %2505 = vmatprep.subr.bf16.mxu0 %v4056_v36  ;;  %2669 = vmatprep.subr.bf16.mxu1 %v4059_v37  ;;  %v4134_v35 = vld [vmem:[%s4849_s20 + $0x38] sm:$0xff]   ;;  %v1038_v37 = vlaneseq }
 0x262   : > { %v4135_v36 = vld [vmem:[%s4849_s20 + $0xb8] sm:$0xff]  }
 0x264   : > { %2506 = vmatpush1.bf16.msra.mxu0 %v4054_v38  ;;  %2670 = vmatpush1.bf16.msra.mxu1 %v4057_v39  ;;  %v1039_v38 = vshrl.u32 %v1038_v37, 7 }
 0x265   : > { %2507 = vmatprep.subr.bf16.mxu0 %v4062_v40  ;;  %2671 = vmatprep.subr.bf16.mxu1 %v4065_v41  ;;  %v1036_v41 = vld [vmem:[%s1035_s11] sm:$0xf] }
 0x266   : > { %v1040_v39 = vsub.s32 0, %v1039_v38  ;;  %v1048_v40 = vsub.s32 2, %v1039_v38 }
 0x268   : > { %2508 = vmatpush1.bf16.msra.mxu0 %v4060_v42  ;;  %2672 = vmatpush1.bf16.msra.mxu1 %v4063_v43  ;;  %v1044_v42 = vsub.s32 1, %v1039_v38  ;;  %v1052_v43 = vsub.s32 3, %v1039_v38 }
 0x269   : > { %2509 = vmatprep.subr.bf16.mxu0 %v4068_v44  ;;  %2673 = vmatprep.subr.bf16.mxu1 %v4071_v45  ;;  %v1041_v44 = vrot.slane %v1036_v41, %v1040_v39  ;;  %v1049_v45 = vrot.slane %v1036_v41, %v1048_v40 }
 0x26c   : > { %2510 = vmatpush1.bf16.msra.mxu0 %v4066_v46  ;;  %2674 = vmatpush1.bf16.msra.mxu1 %v4069_v47  ;;  %v1045_v46 = vrot.slane %v1036_v41, %v1044_v42  ;;  %v1053_v47 = vrot.slane %v1036_v41, %v1052_v43 }
 0x26d   : > { %2511 = vmatprep.subr.bf16.mxu0 %v4074_v48  ;;  %2675 = vmatprep.subr.bf16.mxu1 %v4077_v49 }
 0x270   : > { %2512 = vmatpush1.bf16.msra.mxu0 %v4072_v50  ;;  %2676 = vmatpush1.bf16.msra.mxu1 %v4075_v51 }
 0x271   : > { %2513 = vmatprep.subr.bf16.mxu0 %v4080_v52  ;;  %2677 = vmatprep.subr.bf16.mxu1 %v4083_v53 }
 0x274   : > { %2514 = vmatpush1.bf16.msra.mxu0 %v4078_v54  ;;  %2678 = vmatpush1.bf16.msra.mxu1 %v4081_v55 }
 0x275   : > { %2515 = vmatprep.subr.bf16.mxu0 %v4086_v56  ;;  %2679 = vmatprep.subr.bf16.mxu1 %v4089_v57 }
 0x278   : > { %2516 = vmatpush1.bf16.msra.mxu0 %v4084_v58  ;;  %2680 = vmatpush1.bf16.msra.mxu1 %v4087_v59 }
 0x279   : > { %2517 = vmatprep.subr.bf16.mxu0 %v4092_v60  ;;  %2681 = vmatprep.subr.bf16.mxu1 %v4095_v61 }
 0x27c   : > { %2518 = vmatpush1.bf16.msra.mxu0 %v4090_v62  ;;  %2682 = vmatpush1.bf16.msra.mxu1 %v4093_v63 }
 0x27d   : > { %2519 = vmatprep.subr.bf16.mxu0 %v4098_v0  ;;  %2683 = vmatprep.subr.bf16.mxu1 %v4101_v1 }
 0x280   : > { %2520 = vmatpush1.bf16.msra.mxu0 %v4096_v2  ;;  %2684 = vmatpush1.bf16.msra.mxu1 %v4099_v3 }
 0x281   : > { %3542 = vmatprep.subr.bf16.mxu0 %v4104_v5  ;;  %3564 = vmatprep.subr.bf16.mxu1 %v4105_v6 }
 0x283   : > { %2522 = vmatmul.mubr.bf16.vlgmr.msra.gmra.mrb[0].mxu0 %v3239_v8  ;;  %2686 = vmatmul.mubr.bf16.vlgmr.msra.gmra.mrb[0].mxu1 %v3239_v8 }
 0x284   : > { %3543 = vmatpush3.bf16.msra.mxu0 %v4106_v9  ;;  %3565 = vmatpush3.bf16.msra.mxu1 %v4107_v10 }
 0x285   : > { %3544 = vmatprep.subr.bf16.mxu0 %v4108_v11  ;;  %3566 = vmatprep.subr.bf16.mxu1 %v4109_v12 }
 0x288   : > { %3545 = vmatpush3.bf16.msra.mxu0 %v4110_v4  ;;  %3567 = vmatpush3.bf16.msra.mxu1 %v4111_v7  ;;  %v2702_v7 = vld [vmem:[#allocation3] sm:$0xff] }
 0x289   : > { %3546 = vmatprep.subr.bf16.mxu0 %v4112_v13  ;;  %3568 = vmatprep.subr.bf16.mxu1 %v4113_v14 }
 0x28c   : > { %3547 = vmatpush3.bf16.msra.mxu0 %v4114_v15  ;;  %3569 = vmatpush3.bf16.msra.mxu1 %v4115_v16 }
 0x28d   : > { %3548 = vmatprep.subr.bf16.mxu0 %v4116_v17  ;;  %3570 = vmatprep.subr.bf16.mxu1 %v4117_v18  ;;  %v3050_v17 = vld [vmem:[%s5014_s1] sm:$0xff] (!%p3530_p5)  ;;  %v4375_v18 = vmov (!%p3530_p5), 0  }
 0x28e   : > { %4136 = vset.pattern.permute.xlu0 (!%p3530_p5), %v4375_v18  ;;  %vm3066_vm4 = vcmp.eq.s32.totalorder (!%p3530_p5), %v3050_v17, 0  ;;  %vm3073_vm5 = vcmp.eq.s32.totalorder (!%p3530_p5), %v3050_v17, 1  ;;  %4137 = vset.pattern.permute.xlu1 (!%p3530_p5), %v4375_v18  ;;  %vm3084_vm6 = vcmp.eq.s32.totalorder (!%p3530_p5), %v3050_v17, 2 }
 0x290   : > { %3549 = vmatpush3.bf16.msra.mxu0 %v4118_v19  ;;  %3571 = vmatpush3.bf16.msra.mxu1 %v4119_v20  ;;  %v3067_v19 = vsel (!%p3530_p5), %vm3066_vm4, 1, %v4375_v18  ;;  %v3074_v20 = vsel (!%p3530_p5), %vm3073_vm5, 1, %v4375_v18 }
 0x291   : > { %3550 = vmatprep.subr.bf16.mxu0 %v4120_v21  ;;  %3572 = vmatprep.subr.bf16.mxu1 %v4121_v22  ;;  %v3085_v21 = vsel (!%p3530_p5), %vm3084_vm6, 1, %v4375_v18 }
 0x292   : > { %3069 = vperm.xlu0 (!%p3530_p5), %4136, %v3067_v19  }
 0x294   : > { %3551 = vmatpush3.bf16.msra.mxu0 %v4122_v23  ;;  %3573 = vmatpush3.bf16.msra.mxu1 %v4123_v24  ;;  %v3531_v23 = vld [vmem:[#allocation11] ss:$0 sm:$0xff] (!%p3530_p5) }
 0x295   : > { %3552 = vmatprep.subr.bf16.mxu0 %v4124_v25  ;;  %3574 = vmatprep.subr.bf16.mxu1 %v4125_v26 }
 0x296   : > { %3076 = vperm.xlu0 (!%p3530_p5), %4136, %v3074_v20  }
 0x298   : > { %3553 = vmatpush3.bf16.msra.mxu0 %v4126_v27  ;;  %3575 = vmatpush3.bf16.msra.mxu1 %v4127_v28 }
 0x299   : > { %3554 = vmatprep.subr.bf16.mxu0 %v4128_v29  ;;  %3576 = vmatprep.subr.bf16.mxu1 %v4129_v30 }
 0x29c   : > { %3555 = vmatpush3.bf16.msra.mxu0 %v4130_v31  ;;  %3577 = vmatpush3.bf16.msra.mxu1 %v4131_v32 }
 0x29d   : > { %3556 = vmatprep.subr.bf16.mxu0 %v4132_v33  ;;  %3578 = vmatprep.subr.bf16.mxu1 %v4133_v34 }
 0x2a0   : > { %3557 = vmatpush3.bf16.msra.mxu0 %v4134_v35  ;;  %3579 = vmatpush3.bf16.msra.mxu1 %v4135_v36 }
 0x311   : > { %v3070_v29 = vpop.permute.xlu0 (!%p3530_p5), %3069 }
 0x312   : > { %vm3071_vm7 = vcmp.eq.s32.totalorder (!%p3530_p5), %v3070_v29, 1 }
 0x315   : > { %v3077_v31 = vpop.permute.xlu0 (!%p3530_p5), %3076 }
 0x316   : > { %vm3078_vm8 = vcmp.eq.s32.totalorder (!%p3530_p5), %v3077_v31, 1 }
 0x356   : > { %v2523_v48 = vpop.f32.mrb[0].mxu0  ;;  %v2687_v49 = vpop.f32.mrb[0].mxu1 }
 0x357   : > { %v3586_v50 = vadd.f32 %v2523_v48, %v1041_v44  ;;  %v3588_v51 = vadd.f32 %v2687_v49, %v1049_v45  ;;  %v2525_v52 = vpop.f32.mrb[1].mxu0  ;;  %v2689_v53 = vpop.f32.mrb[1].mxu1 }
 0x358   : > { %v3587_v54 = vadd.f32 %v2525_v52, %v1045_v46  ;;  %v3589_v55 = vadd.f32 %v2689_v53, %v1053_v47  ;;  %v2527_v56 = vpop.f32.mrb[2].mxu0  ;;  %v2691_v57 = vpop.f32.mrb[2].mxu1 }
 0x359   : > { %v2694_v58 = vmax.f32 %v3586_v50, 0.0  ;;  %v2696_v59 = vmax.f32 %v3588_v51, 0.0  ;;  %v2528_v60 = vpop.f32.mrb[3].mxu0  ;;  %v2692_v61 = vpop.f32.mrb[3].mxu1 }
 0x35a   : > { %v2695_v62 = vmax.f32 %v3587_v54, 0.0  ;;  %v2697_v63 = vmax.f32 %v3589_v55, 0.0 }
 0x35b   : > { %v2698_v2 = vpack.c.bf16 %v2694_v58, %v2694_v58  ;;  %v2700_v3 = vpack.c.bf16 %v2696_v59, %v2696_v59 }
 0x35c   : > { %v2699_v0 = vpack.c.bf16 %v2695_v62, %v2695_v62  ;;  %v2701_v1 = vpack.c.bf16 %v2697_v63, %v2697_v63 }
 0x35e   : > { %2995 = vmatprep.mubr.bf16.mxu0 %v2699_v0  ;;  %3035 = vmatprep.mubr.bf16.mxu1 %v2701_v1 }
 0x35f   : > { %2996 = vmatmul.mubr.bf16.vlgmr.msra.gmra.mrb[4].mxu0 %v2698_v2  ;;  %3036 = vmatmul.mubr.bf16.vlgmr.msra.gmra.mrb[4].mxu1 %v2700_v3 }
 0x432   : > { %v3558_v5 = vpop.f32.mrb[4].mxu0  ;;  %v3580_v6 = vpop.f32.mrb[4].mxu1 }
 0x433   : > { %v3559_v8 = vpop.f32.mrb[5].mxu0  ;;  %v3581_v9 = vpop.f32.mrb[5].mxu1 }
 0x434   : > { %v3560_v10 = vadd.f32 %v3559_v8, %v3558_v5  ;;  %v3582_v11 = vadd.f32 %v3581_v9, %v3580_v6  ;;  %v3561_v12 = vpop.f32.mrb[6].mxu0  ;;  %v3583_v4 = vpop.f32.mrb[6].mxu1  ;;  %3049 = sbr.rel (%p3530_p5) target bundleno = 1467 (0x5bb), region = 80 }
 0x435   : > { %v3562_v13 = vpop.f32.mrb[7].mxu0  ;;  %v3584_v14 = vpop.f32.mrb[7].mxu1 }
 0x436   : > { %v3038_v15 = vadd.f32 %v3582_v11, %v3560_v10 }
 0x438   : > { %v3043_v16 = vadd.f32 %v3038_v15, %v2702_v7 }
 0x43a   : > { %3045 = vst.msk [vmem:[#allocation3] sm:$0xff] %vm3044_vm3, %v3043_v16 }
 0x441   : > { %v3051_v22 = vld [vmem:[#allocation3] sm:$0xff] }
 0x442   : > { %v3059_v24 = vadd.f32 %v3531_v23, %v3051_v22 }
 0x444   : > { %v3532_v25 = vmul.f32 -1.442695, %v3059_v24 }
 0x446   : > { %4138 = vpow2.f32 %v3532_v25 }
 0x450   : > { %v4139_v26 = vpop.eup %4138 }
 0x451   : > { %v3063_v27 = vadd.f32 1.0, %v4139_v26 }
 0x453   : > { %4140 = vrcp.f32 %v3063_v27 }
 0x45d   : > { %v4141_v28 = vpop.eup %4140 }
 0x45e   : > { %v3072_v30 = vsel %vm3071_vm7, %v4141_v28, 0.0 }
 0x45f   : > { %3080 = vrot.lane.b32.xlu1 %v3072_v30, %s4376_s27 }
 0x463   : > { %3087 = vperm.xlu1 %4137, %v3085_v21  }
 0x4d1   : > { %v3081_v32 = vpop.permute.xlu1 %3080 }
 0x4d2   : > { %v3083_v33 = vsel %vm3078_vm8, %v4141_v28, %v3081_v32 }
 0x4d3   : > { %3091 = vrot.lane.b32.xlu0 %v3083_v33, %s4376_s27 }
 0x4e2   : > { %v3088_v34 = vpop.permute.xlu1 %3087 }
 0x4e3   : > { %vm3089_vm9 = vcmp.eq.s32.totalorder %v3088_v34, 1 }
 0x545   : > { %v3092_v35 = vpop.permute.xlu0 %3091 }
 0x546   : > { %v3094_v36 = vsel %vm3089_vm9, %v4141_v28, %v3092_v35 }
 0x547   : > { %3096 = vrot.lane.b32.xlu1 %v3094_v36, %s4377_s19 }
 0x5b9   : > { %v3097_v37 = vpop.permute.xlu1 %3096 }
 0x5ba   : > { %3100 = vst.msk [vmem:[#allocation13] sm:$0xff] %vm3099_vm10, %v3097_v37 }
 0x5bb PF: > { %p3662_p9 = scmp.eq.s32.totalorder %s4443_s9, 1  ;;  %s4378_s22 = smov [#allocation13]  }
 0x5bc   : > { %s3108_s12 = sshll.u32 %s4378_s22, 4  ;;  %s3109_s12 = int_to_ptr.vmem [resolvable:$true] %s3108_s12 }
 0x5bd   : > { %s4284_s14 = scalar_lea.vmem %s3109_s12, 128  ;;  %p4291_p0 = scmp.lt.s32.totalorder %s3109_s12, %s3109_s12 }
 0x5be   : > { %p4285_p10 = scmp.ne.s32.totalorder %s3109_s12, %s4284_s14  ;;  %p4292_p3 = scmp.lt.s32.totalorder %s4284_s14, %s4284_s14 }
 0x5c0   : > { %p4286_p1 = pnand %p4285_p10, %p3662_p9  ;;  %p4293_p4 = por %p4292_p3, %p4291_p0 }
 0x5c2   : > { %p4287_p8 = pneg %p4286_p1 }
 0x5c4   : > { %p4294_p2 = pnand %p4293_p4, %p4287_p8 }
 0x5c6   : > { %4297 = shalt.err (!%p4294_p2)
}
 0x5c7   : > { %s4298_s15 = scalar_lea.hbm %s5021_s8, 128 }
 0x5c8   : > { %p4299_p6 = scmp.ne.s32.totalorder %s5021_s8, %s4298_s15  ;;  %p4304_p12 = scmp.lt.u32.totalorder %s4298_s15, %s5021_s8 }
 0x5ca   : > { %p4300_p7 = pnand %p4299_p6, %p3662_p9 }
 0x5cc   : > { %p4301_p11 = pneg %p4300_p7 }
 0x5ce   : > { %p4306_p13 = pnand %p4304_p12, %p4301_p11 }
 0x5d0   : > { %4309 = shalt.err (!%p4306_p13)
}
 0x5d1   : > { %3633 = dma.vmem_to_hbm [thread:$0]  (%p3662_p9), %s3109_s12, 128, %s5021_s8, [#allocation6]  }
 0x5d2   : > { %4347 = dma.done.wait (%p3662_p9), [#allocation6], 128  }
 0x5d3   : > { %4349 = vsyncadd (%p3662_p9), [#allocation6], 4294967168 }
 0x5d4 PF: > { %s5048_s30 = sld [smem:[#allocation20_spill]]  ;;  %s5049_s20 = sld [smem:[#allocation21_spill]] }
 0x5d5   : > { %s5050_s27 = smov %s4356_s28  ;;  %s5051_s28 = smov %s4360_s29 }
 0x5da   : > { %p19_p5 = scmp.ge.s32.totalorder %s5048_s30, 4   ;;  %s5052_s29 = smov %s5049_s20 }
 0x5dc   :  { %21 = sbr.rel (!%p19_p5) target bundleno = 5 (0x5), region = 114 }
 0x5e3   :  { %3121 = vsyncpa [#allocation5], 1 }
 0x5e4   :  { %3123 = vsyncpa [#allocation5 + $0x1], 1 }
 0x5e5   :  { %3124 = vsyncpa [#allocation8], 1 }
 0x5e6   :  { %3125 = vsyncpa [#allocation12], 1 }
 0x5e7   :  { %3126 = vsyncpa [#allocation6], 1 }
 0x5e8   :  { %3128 = vsyncpa [#allocation6 + $0x1], 1 }

</bundles_post_ra>
